<compile_context>
chip_gen: v7x
topology: tpu7x:2x2x1
jax: 0.10.0
libtpu: 0.0.40
codegen_flags: <defaults>
</compile_context>

<pallas_src>
import math
import functools

import jax
import jax.numpy as jnp
from jax import lax
from jax.experimental import pallas as pl
from jax.experimental.pallas import tpu as pltpu


# --------------------------------------------------------------------------
# Fused kernel: 3x3 conv(+BN+leaky) -> fused 1x1 heads -> full decode
# (one TN-lane tile of the flattened (b, y, x) axis per grid step)
# --------------------------------------------------------------------------
def _head1_kernel(xs_ref, grid_ref, mask_ref, dcoff_ref,
                  wcol_ref, shift_ref, wh_ref, bh_ref,
                  out1_ref, bbox_ref, oloc_ref, ocls_ref, coor_ref,
                  mloc_ref, mcls_ref, w8_ref,
                  head_scr, *, stride):
    # xs_ref:    (3*Cin, TN) bf16  -- 3 vertically shifted copies of [x, gx, gy]
    # grid_ref:  (2, TN) f32       -- gx (row 0), gy (row 1) for the decode
    # mask_ref:  (2, TN) f32       -- left-edge / right-edge column masks (x!=0, x!=S-1)
    # dcoff_ref: (18, 1) f32       -- dc_off y/x additive constants
    # wcol_ref:  (3, Cmid, 3*Cin) bf16 -- per-horizontal-tap conv weights (BN folded)
    # shift_ref: (Cmid, 1) f32     -- folded BN shift
    # wh_ref:    (64, Cmid) bf16   -- fused 1x1 heads (0:10 loc, 10:58 mask, pad)
    # bh_ref:    (64, 1) f32
    # outputs (channel-first, lane-dense):
    #   out1 (10,TN) bbox (14,TN) oloc (18,TN) ocls (18,TN) coor (18,TN)
    #   mloc (9,TN) mcls (9,TN) w8 (8,TN)
    # head_scr:  VMEM (64, TN) f32
    f32 = jnp.float32
    bf16 = jnp.bfloat16
    TN = out1_ref.shape[-1]
    st = float(stride)
    inv_st = 1.0 / st
    sq = lambda t: t * t
    rcp = lambda d: pl.reciprocal(d, approx=True)

    # ---- 3x3 conv: 3 column-partial MXU matmuls + lane rolls + edge masks ----
    xs = xs_ref[...]                                                    # (3*Cin, TN)
    m0 = jnp.dot(wcol_ref[0], xs, preferred_element_type=f32)          # left taps
    m1 = jnp.dot(wcol_ref[1], xs, preferred_element_type=f32)          # centre taps
    m2 = jnp.dot(wcol_ref[2], xs, preferred_element_type=f32)          # right taps
    mask_l = mask_ref[0:1, :]
    mask_r = mask_ref[1:2, :]
    feat = (pltpu.roll(m0, 1, axis=1) * mask_l + m1
            + pltpu.roll(m2, TN - 1, axis=1) * mask_r + shift_ref[...])
    feat = jnp.where(feat > 0, feat, 0.1 * feat)                        # LeakyReLU(0.1)

    # ---- fused 1x1 heads -> (64, TN) scratch: [0:10]=loc raw, [10:58]=conv_mask ----
    head_scr[...] = jnp.dot(wh_ref[...], feat.astype(bf16),
                            preferred_element_type=f32) + bh_ref[...]

    out1_ref[...] = head_scr[0:10, :]                                   # raw loc head

    gx = grid_ref[0:1, :]
    gy = grid_ref[1:2, :]

    # ---- mask / softmax heads (lane-dense slab stores) ----
    mm = jax.nn.sigmoid(head_scr[10:28, :])                             # (18, TN)
    mloc_ref[...] = mm[0:9, :]
    mcls_ref[...] = mm[9:18, :]
    wc8 = head_scr[50:58, :]
    wc8 = wc8 - jnp.max(wc8, axis=0, keepdims=True)
    ew = jnp.exp(wc8)
    w8_ref[...] = ew * rcp(jnp.sum(ew, axis=0, keepdims=True))

    # ---- box decode ----
    raw_l = head_scr[0:4, :]
    l = raw_l * raw_l * st                                              # (4, TN)
    l0, l1, l2, l3 = (l[i:i + 1, :] for i in range(4))
    cx = gx * st + st * 0.5
    cy = gy * st + st * 0.5
    xmin = cx - l3
    ymin = cy - l0
    xmax = cx + l1
    ymax = cy + l2
    w = l1 + l3
    h = l0 + l2

    src = jax.nn.sigmoid(head_scr[4:10, :])                             # s(4), r, conf
    r = src[4:5, :]
    maskr = jnp.where(r > 0.9, jnp.zeros_like(r), jnp.ones_like(r))
    s = src[0:4, :] * maskr
    conf = src[5:6, :]

    bbox_ref[...] = jnp.concatenate(
        [(xmax + xmin) * 0.5, (ymax + ymin) * 0.5, w, h, s, r, l, conf], axis=0)

    s0, s1, s2, s3 = (s[i:i + 1, :] for i in range(4))
    x1 = xmin + s0 * w
    x7 = xmax - s2 * w
    y5 = ymin + s1 * h
    y3 = ymax - s3 * h
    x_obb = (x1 + x7) * 0.5
    y_obb = (y5 + y3) * 0.5

    offv = jax.nn.sigmoid(head_scr[28:50, :])                           # (22, TN)
    off0, off1, off2, off3 = (offv[i:i + 1, :] for i in range(4))
    dc_y = offv[4:13, :]
    dc_x = offv[13:22, :]

    eps = jnp.ceil(0.01 * w)
    cond0 = x1 < xmin + eps
    xp0 = jnp.where(cond0, x1, xmin + off0 * (x1 - xmin))
    yp0 = jnp.where(cond0, ymin + off0 * (y3 - ymin),
                    (y3 - ymin) * rcp(xmin - x1 + 1e-8) * (xp0 - x1) + ymin)
    cond1 = x1 > xmax - eps
    xp2 = jnp.where(cond1, x1, xmax - off1 * (xmax - x1))
    yp2 = jnp.where(cond1, ymin + off1 * (y5 - ymin),
                    (y5 - ymin) * rcp(xmax - x1 + 1e-8) * (xp2 - x1) + ymin)
    cond2 = x7 < xmin + eps
    xp6 = jnp.where(cond2, x7, xmin + off2 * (x7 - xmin))
    yp6 = jnp.where(cond2, ymax - off2 * (ymax - y3),
                    (y3 - ymax) * rcp(xmin - x7 + 1e-8) * (xp6 - x7) + ymax)
    cond3 = x7 > xmax - eps
    xp8 = jnp.where(cond3, x7, xmax - off3 * (xmax - x7))
    yp8 = jnp.where(cond3, ymax - off3 * (ymax - y5),
                    (y5 - ymax) * rcp(xmax - x7 + 1e-8) * (xp8 - x7) + ymax)

    zeros = jnp.zeros_like(gx)
    # offsets_loc channel order matches the torch cat; single (18, TN) slab store.
    oloc_ref[...] = jnp.concatenate([
        yp0 * inv_st + 1.0 - gy,
        xp0 * inv_st + 1.0 - gx,
        ymin * inv_st + 1.0 - gy,
        x1 * inv_st - gx,
        yp2 * inv_st + 1.0 - gy,
        xp2 * inv_st - 1.0 - gx,
        y3 * inv_st - gy,
        xmin * inv_st + 1.0 - gx,
        zeros,
        zeros,
        y5 * inv_st - gy,
        xmax * inv_st - 1.0 - gx,
        yp6 * inv_st - 1.0 - gy,
        xp6 * inv_st + 1.0 - gx,
        ymax * inv_st - 1.0 - gy,
        x7 * inv_st - gx,
        yp8 * inv_st - 1.0 - gy,
        xp8 * inv_st - 1.0 - gx,
    ], axis=0)

    width = (jnp.sqrt(sq(x1 - xmax) + sq(ymin - y5))
             + jnp.sqrt(sq(xmin - x7) + sq(y3 - ymax))) * 0.5
    height = (jnp.sqrt(sq(xmin - x1) + sq(y3 - ymin))
              + jnp.sqrt(sq(x7 - xmax) + sq(ymax - y5))) * 0.5

    # angle = (arctan(a)+arctan(b))/2; only cos/sin are needed, in closed form.
    # TODO(synk): may differ from torch.atan beyond ulp level at degenerate boxes.
    ta = (y5 - ymin) * rcp(xmax - x1 + 1e-4)
    tb = (ymax - y3) * rcp(x7 - xmin + 1e-4)
    c2t = (1.0 - ta * tb) * lax.rsqrt((1.0 + ta * ta) * (1.0 + tb * tb))
    cos_t = jnp.sqrt(jnp.maximum((1.0 + c2t) * 0.5, 0.0))
    sin_t = jnp.where(ta + tb >= 0.0, 1.0, -1.0) * \
        jnp.sqrt(jnp.maximum((1.0 - c2t) * 0.5, 0.0))

    xd = x_obb - width * 0.5 + dc_x * width                             # (9, TN)
    yd = y_obb - height * 0.5 + dc_y * height                           # (9, TN)
    xd0 = cos_t * (xd - x_obb) - sin_t * (yd - y_obb) + x_obb
    xd_ = jnp.where(jnp.where(xd0 >= xmin, xd0, xmin) <= xmax, xd0, xmax)
    yd0 = sin_t * (xd - x_obb) + cos_t * (yd - y_obb) + y_obb
    yd_ = jnp.where(jnp.where(yd0 >= ymin, yd0, ymin) <= ymax, yd0, ymax)

    coor_ref[...] = jnp.concatenate([xd_, yd_], axis=0)                 # (18, TN)

    # offsets_cls as two 9-row slabs [y rows | x rows]; channel interleave is
    # done for free by the wrapper reshape.
    ocls_ref[...] = jnp.concatenate(
        [yd_ * inv_st - gy + dcoff_ref[0:9, :],
         xd_ * inv_st - gx + dcoff_ref[9:18, :]], axis=0)


# --------------------------------------------------------------------------
# Parameters (deterministic synthetic init), pre-folded / fused for the kernel
# --------------------------------------------------------------------------
def init_params(key, filters_in):
    C = filters_in
    Cin, Cmid = C + 2, 2 * C
    ks = jax.random.split(key, 9)
    f32 = jnp.float32
    w3 = 0.1 * jax.random.normal(ks[0], (Cmid, Cin, 3, 3), f32)         # OIHW
    gamma = 1.0 + 0.1 * jax.random.normal(ks[1], (Cmid,), f32)
    beta = 0.1 * jax.random.normal(ks[2], (Cmid,), f32)
    rmean = 0.1 * jax.random.normal(ks[3], (Cmid,), f32)
    rvar = jnp.abs(1.0 + 0.1 * jax.random.normal(ks[4], (Cmid,), f32))
    wloc = 0.1 * jax.random.normal(ks[5], (10, Cmid), f32)
    bloc = 0.1 * jax.random.normal(ks[6], (10,), f32)
    wmask = 0.1 * jax.random.normal(ks[7], (48, Cmid), f32)
    bmask = 0.1 * jax.random.normal(ks[8], (48,), f32)

    # Fold BatchNorm (inference) into the conv weights / a per-channel shift.
    bn_scale = gamma / jnp.sqrt(rvar + 1e-5)
    bn_shift = beta - rmean * bn_scale

    # Conv weights grouped by horizontal tap dx: wcol[dx, o, dy*Cin + c].
    wcol = jnp.transpose(w3, (3, 0, 2, 1)).reshape(3, Cmid, 3 * Cin)
    wcol = (wcol * bn_scale[None, :, None]).astype(jnp.bfloat16)

    # Fused 1x1 heads, padded to 64 output rows: [0:10]=loc, [10:58]=mask.
    wh = jnp.zeros((64, Cmid), f32).at[0:10].set(wloc).at[10:58].set(wmask)
    bh = jnp.zeros((64, 1), f32).at[0:10, 0].set(bloc).at[10:58, 0].set(bmask)

    return dict(wcol=wcol, shift=bn_shift.reshape(Cmid, 1),
                wh=wh.astype(jnp.bfloat16), bh=bh)


def _pick_tile(N, S):
    """Row-aligned lane-tile size: multiple of S dividing N, preferably a
    multiple of 128, <= 512 lanes, and smaller than N (so the grid pipelines)."""
    cands = [t for t in range(S, N + 1, S) if N % t == 0]
    good = [t for t in cands if t % 128 == 0 and t <= 512 and t < N]
    if not good:
        good = [t for t in cands if t % 128 == 0 and t <= 512]
    if not good:
        good = [t for t in cands if t <= 512]
    if not good:
        good = [min(cands)]
    return max(good)


# --------------------------------------------------------------------------
# Forward wrapper: shifted-stack build, tiled pallas_call, output reshapes
# --------------------------------------------------------------------------
@functools.partial(jax.jit, static_argnames=("stride",))
def head1_forward(x_nchw, params, *, stride):
    B, C, S, S2 = x_nchw.shape
    assert S == S2
    Cin = C + 2
    SS = S * S
    N = B * SS
    f32 = jnp.float32

    TN = _pick_tile(N, S)
    n_tiles = N // TN

    # --- conv input: [x, gx, gy], 3 vertically shifted copies, channel-first ---
    x = x_nchw.astype(f32)
    ar = jnp.arange(S, dtype=f32)
    gx_im = jnp.broadcast_to(ar[None, :], (S, S))                   # column index
    gy_im = jnp.broadcast_to(ar[:, None], (S, S))                   # row index
    gx = jnp.broadcast_to(gx_im[None, None], (B, 1, S, S))
    gy = jnp.broadcast_to(gy_im[None, None], (B, 1, S, S))
    x11 = jnp.concatenate([x, gx, gy], axis=1)                      # (B, Cin, S, S)
    xrp = jnp.pad(x11, ((0, 0), (0, 0), (1, 1), (0, 0)))            # row-pad only
    xs = jnp.stack([xrp[:, :, dy:dy + S, :] for dy in range(3)], axis=0)
    xs = jnp.transpose(xs, (0, 2, 1, 3, 4)).reshape(3 * Cin, N).astype(jnp.bfloat16)

    # decode grid coordinates (f32, exact) and the left/right edge column masks
    gridxy = jnp.stack([jnp.tile(gx_im.reshape(-1), B),
                        jnp.tile(gy_im.reshape(-1), B)]).astype(f32)       # (2, N)
    xloc = jnp.arange(TN) % S
    masks = jnp.stack([(xloc != 0), (xloc != S - 1)]).astype(f32)          # (2, TN)

    dist = math.sqrt(2.0) / 2.0
    ay = jnp.array([dist, 1.0, dist, 0.0, 0.0, 0.0, -dist, -1.0, -dist], f32)
    ax = jnp.array([dist, 0.0, -dist, 1.0, 0.0, -1.0, dist, 0.0, -dist], f32)
    dcoff = jnp.concatenate([ay, ax]).reshape(18, 1)

    Cmid = params["shift"].shape[0]
    K3 = 3 * Cin
    out_rows = (10, 14, 18, 18, 18, 9, 9, 8)
    out_shapes = tuple(jax.ShapeDtypeStruct((r, N), f32) for r in out_rows)

    in_specs = [
        pl.BlockSpec((K3, TN), lambda i: (0, i)),          # shifted stack (tiled)
        pl.BlockSpec((2, TN), lambda i: (0, i)),           # gx / gy (tiled)
        pl.BlockSpec((2, TN), lambda i: (0, 0)),           # column masks (const)
        pl.BlockSpec((18, 1), lambda i: (0, 0)),           # dc offsets (const)
        pl.BlockSpec((3, Cmid, K3), lambda i: (0, 0, 0)),  # conv weights (const)
        pl.BlockSpec((Cmid, 1), lambda i: (0, 0)),         # BN shift (const)
        pl.BlockSpec((64, Cmid), lambda i: (0, 0)),        # fused heads (const)
        pl.BlockSpec((64, 1), lambda i: (0, 0)),           # fused head bias (const)
    ]
    out_specs = tuple(pl.BlockSpec((r, TN), lambda i: (0, i)) for r in out_rows)

    # VMEM budget from the actual tile footprint (double-buffered ins/outs + scratch)
    tile_bytes = (2 * TN * (K3 * 2 + 2 * 4)
                  + 2 * TN * sum(out_rows) * 4
                  + TN * 64 * 4)
    vmem_limit = int(min(max(4 * tile_bytes, 4 << 20), 48 << 20))

    outs = pl.pallas_call(
        functools.partial(_head1_kernel, stride=stride),
        out_shape=out_shapes,
        grid=(n_tiles,),
        in_specs=in_specs,
        out_specs=out_specs,
        scratch_shapes=[pltpu.VMEM((64, TN), f32)],
        compiler_params=pltpu.CompilerParams(
            dimension_semantics=("parallel",),
            vmem_limit_bytes=vmem_limit),
    )(xs, gridxy, masks, dcoff, params["wcol"], params["shift"],
      params["wh"], params["bh"])

    out1_k, bbox_k, oloc_k, ocls_k, coor_k, mloc_k, mcls_k, w8_k = outs

    def chw(t):   # (C, N) -> (B, C, S, S)
        return jnp.transpose(t.reshape(t.shape[0], B, S, S), (1, 0, 2, 3))

    def hwc(t):   # (C, N) -> (B, S, S, C)
        return jnp.transpose(t.reshape(t.shape[0], B, S, S), (1, 2, 3, 0))

    # interleave the [y rows | x rows] slab into (y0, x0, y1, x1, ...) channels
    ocls = jnp.transpose(ocls_k.reshape(2, 9, B, S, S),
                         (2, 1, 0, 3, 4)).reshape(B, 18, S, S)

    return (hwc(out1_k),                 # out1.permute(0,2,3,1)  (B,S,S,10)
            hwc(bbox_k),                 # out1_de                (B,S,S,14)
            chw(oloc_k),                 # offsets_loc            (B,18,S,S)
            ocls,                        # offsets_cls            (B,18,S,S)
            chw(mloc_k),                 # mask_loc               (B,9,S,S)
            chw(mcls_k),                 # mask_cls               (B,9,S,S)
            chw(w8_k),                   # weight_c8              (B,8,S,S)
            jnp.transpose(coor_k))       # offsets_d              (B*S*S,18)


if __name__ == "__main__":
    B, C, S = 2, 4, 16          # batch, filters_in, spatial
    stride = 8
    key = jax.random.PRNGKey(0)
    kx, kp = jax.random.split(key)
    x = jax.random.normal(kx, (B, C, S, S), jnp.float32)
    params = init_params(kp, C)

    outs = head1_forward(x, params, stride=stride)
    outs = jax.block_until_ready(outs)

    expected = [(B, S, S, 10), (B, S, S, 14), (B, 18, S, S), (B, 18, S, S),
                (B, 9, S, S), (B, 9, S, S), (B, 8, S, S), (B * S * S, 18)]
    assert all(o.shape == e for o, e in zip(outs, expected)), \
        [o.shape for o in outs]
    assert all(bool(jnp.all(jnp.isfinite(o))) for o in outs)
    print("KERNEL_OK")
</pallas_src>

<mosaic_0001>
module attributes {stable_mosaic.version = 11 : i64} {
  func.func @_head1_kernel(%arg0: i32, %arg1: memref<18x256xbf16, #tpu.memory_space<vmem>>, %arg2: memref<2x256xf32, #tpu.memory_space<vmem>>, %arg3: memref<2x256xf32, #tpu.memory_space<vmem>>, %arg4: memref<18x1xf32, #tpu.memory_space<vmem>>, %arg5: memref<3x8x18xbf16, #tpu.memory_space<vmem>>, %arg6: memref<8x1xf32, #tpu.memory_space<vmem>>, %arg7: memref<64x8xbf16, #tpu.memory_space<vmem>>, %arg8: memref<64x1xf32, #tpu.memory_space<vmem>>, %arg9: memref<10x256xf32, #tpu.memory_space<vmem>>, %arg10: memref<14x256xf32, #tpu.memory_space<vmem>>, %arg11: memref<18x256xf32, #tpu.memory_space<vmem>>, %arg12: memref<18x256xf32, #tpu.memory_space<vmem>>, %arg13: memref<18x256xf32, #tpu.memory_space<vmem>>, %arg14: memref<9x256xf32, #tpu.memory_space<vmem>>, %arg15: memref<9x256xf32, #tpu.memory_space<vmem>>, %arg16: memref<8x256xf32, #tpu.memory_space<vmem>>, %arg17: memref<64x256xf32, #tpu.memory_space<vmem>>) attributes {dimension_semantics = [#tpu.dimension_semantics<parallel>], iteration_bounds = array<i64: 2>, scalar_prefetch = 0 : i64, scratch_operands = 1 : i64, tpu.core_type = #tpu.core_type<tc>, window_params = [{transform_indices = @transform_0, window_bounds = array<i64: 18, 256>}, {transform_indices = @transform_1, window_bounds = array<i64: 2, 256>}, {pipeline_mode = #tpu.pipeline_mode<synchronous>, transform_indices = @transform_2, window_bounds = array<i64: 2, 256>}, {pipeline_mode = #tpu.pipeline_mode<synchronous>, transform_indices = @transform_3, window_bounds = array<i64: 18, 1>}, {pipeline_mode = #tpu.pipeline_mode<synchronous>, transform_indices = @transform_4, window_bounds = array<i64: 3, 8, 18>}, {pipeline_mode = #tpu.pipeline_mode<synchronous>, transform_indices = @transform_5, window_bounds = array<i64: 8, 1>}, {pipeline_mode = #tpu.pipeline_mode<synchronous>, transform_indices = @transform_6, window_bounds = array<i64: 64, 8>}, {pipeline_mode = #tpu.pipeline_mode<synchronous>, transform_indices = @transform_7, window_bounds = array<i64: 64, 1>}, {transform_indices = @transform_8, window_bounds = array<i64: 10, 256>}, {transform_indices = @transform_9, window_bounds = array<i64: 14, 256>}, {transform_indices = @transform_10, window_bounds = array<i64: 18, 256>}, {transform_indices = @transform_11, window_bounds = array<i64: 18, 256>}, {transform_indices = @transform_12, window_bounds = array<i64: 18, 256>}, {transform_indices = @transform_13, window_bounds = array<i64: 9, 256>}, {transform_indices = @transform_14, window_bounds = array<i64: 9, 256>}, {transform_indices = @transform_15, window_bounds = array<i64: 8, 256>}]} {
    %c0 = arith.constant 0 : index
    %c0_0 = arith.constant 0 : index
    %0 = vector.load %arg1[%c0, %c0_0] : memref<18x256xbf16, #tpu.memory_space<vmem>>, vector<18x256xbf16>
    %c0_1 = arith.constant 0 : index
    %c0_2 = arith.constant 0 : index
    %c0_3 = arith.constant 0 : index
    %1 = vector.load %arg5[%c0_1, %c0_2, %c0_3] : memref<3x8x18xbf16, #tpu.memory_space<vmem>>, vector<1x8x18xbf16>
    %2 = vector.shape_cast %1 : vector<1x8x18xbf16> to vector<8x18xbf16>
    %cst = arith.constant dense<0.000000e+00> : vector<8x256xf32>
    %3 = tpu.matmul %2, %0, %cst {dimension_numbers = #tpu.dot_dimension_numbers<[1], [0], [0], [1], [0, 0, 1, 1], [], []>} : vector<8x18xbf16>, vector<18x256xbf16>, vector<8x256xf32> -> vector<8x256xf32>
    %c1 = arith.constant 1 : index
    %c0_4 = arith.constant 0 : index
    %c0_5 = arith.constant 0 : index
    %4 = vector.load %arg5[%c1, %c0_4, %c0_5] : memref<3x8x18xbf16, #tpu.memory_space<vmem>>, vector<1x8x18xbf16>
    %5 = vector.shape_cast %4 : vector<1x8x18xbf16> to vector<8x18xbf16>
    %cst_6 = arith.constant dense<0.000000e+00> : vector<8x256xf32>
    %6 = tpu.matmul %5, %0, %cst_6 {dimension_numbers = #tpu.dot_dimension_numbers<[1], [0], [0], [1], [0, 0, 1, 1], [], []>} : vector<8x18xbf16>, vector<18x256xbf16>, vector<8x256xf32> -> vector<8x256xf32>
    %c2 = arith.constant 2 : index
    %c0_7 = arith.constant 0 : index
    %c0_8 = arith.constant 0 : index
    %7 = vector.load %arg5[%c2, %c0_7, %c0_8] : memref<3x8x18xbf16, #tpu.memory_space<vmem>>, vector<1x8x18xbf16>
    %8 = vector.shape_cast %7 : vector<1x8x18xbf16> to vector<8x18xbf16>
    %cst_9 = arith.constant dense<0.000000e+00> : vector<8x256xf32>
    %9 = tpu.matmul %8, %0, %cst_9 {dimension_numbers = #tpu.dot_dimension_numbers<[1], [0], [0], [1], [0, 0, 1, 1], [], []>} : vector<8x18xbf16>, vector<18x256xbf16>, vector<8x256xf32> -> vector<8x256xf32>
    %c0_10 = arith.constant 0 : index
    %c0_11 = arith.constant 0 : index
    %10 = vector.load %arg3[%c0_10, %c0_11] : memref<2x256xf32, #tpu.memory_space<vmem>>, vector<1x256xf32>
    %c1_12 = arith.constant 1 : index
    %c0_13 = arith.constant 0 : index
    %11 = vector.load %arg3[%c1_12, %c0_13] : memref<2x256xf32, #tpu.memory_space<vmem>>, vector<1x256xf32>
    %c1_i32 = arith.constant 1 : i32
    %12 = tpu.dynamic_rotate %3 by %c1_i32 dim 1 : vector<8x256xf32>, i32 -> vector<8x256xf32>
    %13 = vector.broadcast %10 : vector<1x256xf32> to vector<8x256xf32>
    %14 = arith.mulf %12, %13 : vector<8x256xf32>
    %15 = arith.addf %14, %6 : vector<8x256xf32>
    %c255_i32 = arith.constant 255 : i32
    %16 = tpu.dynamic_rotate %9 by %c255_i32 dim 1 : vector<8x256xf32>, i32 -> vector<8x256xf32>
    %17 = vector.broadcast %11 : vector<1x256xf32> to vector<8x256xf32>
    %18 = arith.mulf %16, %17 : vector<8x256xf32>
    %19 = arith.addf %15, %18 : vector<8x256xf32>
    %c0_14 = arith.constant 0 : index
    %c0_15 = arith.constant 0 : index
    %20 = vector.load %arg6[%c0_14, %c0_15] : memref<8x1xf32, #tpu.memory_space<vmem>>, vector<8x1xf32>
    %21 = vector.broadcast %20 : vector<8x1xf32> to vector<8x256xf32>
    %22 = arith.addf %19, %21 : vector<8x256xf32>
    %cst_16 = arith.constant 0.000000e+00 : f32
    %23 = vector.broadcast %cst_16 : f32 to vector<8x256xf32>
    %24 = arith.cmpf ogt, %22, %23 : vector<8x256xf32>
    %cst_17 = arith.constant 1.000000e-01 : f32
    %25 = vector.broadcast %cst_17 : f32 to vector<8x256xf32>
    %26 = arith.mulf %25, %22 : vector<8x256xf32>
    %27 = arith.select %24, %22, %26 : vector<8x256xi1>, vector<8x256xf32>
    %c0_18 = arith.constant 0 : index
    %c0_19 = arith.constant 0 : index
    %28 = vector.load %arg7[%c0_18, %c0_19] : memref<64x8xbf16, #tpu.memory_space<vmem>>, vector<64x8xbf16>
    %29 = arith.truncf %27 : vector<8x256xf32> to vector<8x256xbf16>
    %cst_20 = arith.constant dense<0.000000e+00> : vector<64x256xf32>
    %30 = tpu.matmul %28, %29, %cst_20 {dimension_numbers = #tpu.dot_dimension_numbers<[1], [0], [0], [1], [0, 0, 1, 1], [], []>} : vector<64x8xbf16>, vector<8x256xbf16>, vector<64x256xf32> -> vector<64x256xf32>
    %c0_21 = arith.constant 0 : index
    %c0_22 = arith.constant 0 : index
    %31 = vector.load %arg8[%c0_21, %c0_22] : memref<64x1xf32, #tpu.memory_space<vmem>>, vector<64x1xf32>
    %32 = vector.broadcast %31 : vector<64x1xf32> to vector<64x256xf32>
    %33 = arith.addf %30, %32 : vector<64x256xf32>
    %c0_23 = arith.constant 0 : index
    %c0_24 = arith.constant 0 : index
    %34 = vector.load %arg17[%c0_23, %c0_24] : memref<64x256xf32, #tpu.memory_space<vmem>>, vector<64x256xf32>
    tpu.vector_store %arg17[%c0_23, %c0_24], %33 {strides = array<i32>} : memref<64x256xf32, #tpu.memory_space<vmem>>, vector<64x256xf32>,
    %c0_25 = arith.constant 0 : index
    %c0_26 = arith.constant 0 : index
    %35 = vector.load %arg17[%c0_25, %c0_26] : memref<64x256xf32, #tpu.memory_space<vmem>>, vector<10x256xf32>
    %c0_27 = arith.constant 0 : index
    %c0_28 = arith.constant 0 : index
    %36 = vector.load %arg9[%c0_27, %c0_28] : memref<10x256xf32, #tpu.memory_space<vmem>>, vector<10x256xf32>
    tpu.vector_store %arg9[%c0_27, %c0_28], %35 {strides = array<i32>} : memref<10x256xf32, #tpu.memory_space<vmem>>, vector<10x256xf32>,
    %c0_29 = arith.constant 0 : index
    %c0_30 = arith.constant 0 : index
    %37 = vector.load %arg2[%c0_29, %c0_30] : memref<2x256xf32, #tpu.memory_space<vmem>>, vector<1x256xf32>
    %c1_31 = arith.constant 1 : index
    %c0_32 = arith.constant 0 : index
    %38 = vector.load %arg2[%c1_31, %c0_32] : memref<2x256xf32, #tpu.memory_space<vmem>>, vector<1x256xf32>
    %c10 = arith.constant 10 : index
    %c0_33 = arith.constant 0 : index
    %39 = vector.load %arg17[%c10, %c0_33] : memref<64x256xf32, #tpu.memory_space<vmem>>, vector<18x256xf32>
    %40 = arith.negf %39 : vector<18x256xf32>
    %41 = math.exp %40 : vector<18x256xf32>
    %cst_34 = arith.constant 1.000000e+00 : f32
    %42 = vector.broadcast %cst_34 : f32 to vector<18x256xf32>
    %43 = arith.addf %42, %41 : vector<18x256xf32>
    %44 = arith.divf %42, %43 : vector<18x256xf32>
    %45 = vector.extract_strided_slice %44 {offsets = [0, 0], sizes = [9, 256], strides = [1, 1]} : vector<18x256xf32> to vector<9x256xf32>
    %c0_35 = arith.constant 0 : index
    %c0_36 = arith.constant 0 : index
    %46 = vector.load %arg14[%c0_35, %c0_36] : memref<9x256xf32, #tpu.memory_space<vmem>>, vector<9x256xf32>
    tpu.vector_store %arg14[%c0_35, %c0_36], %45 {strides = array<i32>} : memref<9x256xf32, #tpu.memory_space<vmem>>, vector<9x256xf32>,
    %47 = vector.extract_strided_slice %44 {offsets = [9, 0], sizes = [9, 256], strides = [1, 1]} : vector<18x256xf32> to vector<9x256xf32>
    %c0_37 = arith.constant 0 : index
    %c0_38 = arith.constant 0 : index
    %48 = vector.load %arg15[%c0_37, %c0_38] : memref<9x256xf32, #tpu.memory_space<vmem>>, vector<9x256xf32>
    tpu.vector_store %arg15[%c0_37, %c0_38], %47 {strides = array<i32>} : memref<9x256xf32, #tpu.memory_space<vmem>>, vector<9x256xf32>,
    %c50 = arith.constant 50 : index
    %c0_39 = arith.constant 0 : index
    %49 = vector.load %arg17[%c50, %c0_39] : memref<64x256xf32, #tpu.memory_space<vmem>>, vector<8x256xf32>
    %cst_40 = arith.constant dense<0xFF800000> : vector<256xf32>
    %50 = vector.multi_reduction <maximumf>, %49, %cst_40 [0] : vector<8x256xf32> to vector<256xf32>
    %51 = vector.shape_cast %50 : vector<256xf32> to vector<1x256xf32>
    %52 = vector.broadcast %51 : vector<1x256xf32> to vector<8x256xf32>
    %53 = arith.subf %49, %52 : vector<8x256xf32>
    %54 = math.exp %53 : vector<8x256xf32>
    %cst_41 = arith.constant dense<0.000000e+00> : vector<256xf32>
    %55 = vector.multi_reduction <add>, %54, %cst_41 [0] : vector<8x256xf32> to vector<256xf32>
    %56 = vector.shape_cast %55 : vector<256xf32> to vector<1x256xf32>
    %57 = tpu.reciprocal %56 {approx = true} : vector<1x256xf32> -> vector<1x256xf32>
    %58 = vector.broadcast %57 : vector<1x256xf32> to vector<8x256xf32>
    %59 = arith.mulf %54, %58 : vector<8x256xf32>
    %c0_42 = arith.constant 0 : index
    %c0_43 = arith.constant 0 : index
    %60 = vector.load %arg16[%c0_42, %c0_43] : memref<8x256xf32, #tpu.memory_space<vmem>>, vector<8x256xf32>
    tpu.vector_store %arg16[%c0_42, %c0_43], %59 {strides = array<i32>} : memref<8x256xf32, #tpu.memory_space<vmem>>, vector<8x256xf32>,
    %c0_44 = arith.constant 0 : index
    %c0_45 = arith.constant 0 : index
    %61 = vector.load %arg17[%c0_44, %c0_45] : memref<64x256xf32, #tpu.memory_space<vmem>>, vector<4x256xf32>
    %62 = arith.mulf %61, %61 : vector<4x256xf32>
    %cst_46 = arith.constant 8.000000e+00 : f32
    %63 = vector.broadcast %cst_46 : f32 to vector<4x256xf32>
    %64 = arith.mulf %62, %63 : vector<4x256xf32>
    %65 = vector.extract_strided_slice %64 {offsets = [0, 0], sizes = [1, 256], strides = [1, 1]} : vector<4x256xf32> to vector<1x256xf32>
    %66 = vector.extract_strided_slice %64 {offsets = [1, 0], sizes = [1, 256], strides = [1, 1]} : vector<4x256xf32> to vector<1x256xf32>
    %67 = vector.extract_strided_slice %64 {offsets = [2, 0], sizes = [1, 256], strides = [1, 1]} : vector<4x256xf32> to vector<1x256xf32>
    %68 = vector.extract_strided_slice %64 {offsets = [3, 0], sizes = [1, 256], strides = [1, 1]} : vector<4x256xf32> to vector<1x256xf32>
    %cst_47 = arith.constant 8.000000e+00 : f32
    %69 = vector.broadcast %cst_47 : f32 to vector<1x256xf32>
    %70 = arith.mulf %37, %69 : vector<1x256xf32>
    %cst_48 = arith.constant 4.000000e+00 : f32
    %71 = vector.broadcast %cst_48 : f32 to vector<1x256xf32>
    %72 = arith.addf %70, %71 : vector<1x256xf32>
    %cst_49 = arith.constant 8.000000e+00 : f32
    %73 = vector.broadcast %cst_49 : f32 to vector<1x256xf32>
    %74 = arith.mulf %38, %73 : vector<1x256xf32>
    %cst_50 = arith.constant 4.000000e+00 : f32
    %75 = vector.broadcast %cst_50 : f32 to vector<1x256xf32>
    %76 = arith.addf %74, %75 : vector<1x256xf32>
    %77 = arith.subf %72, %68 : vector<1x256xf32>
    %78 = arith.subf %76, %65 : vector<1x256xf32>
    %79 = arith.addf %72, %66 : vector<1x256xf32>
    %80 = arith.addf %76, %67 : vector<1x256xf32>
    %81 = arith.addf %66, %68 : vector<1x256xf32>
    %82 = arith.addf %65, %67 : vector<1x256xf32>
    %c4 = arith.constant 4 : index
    %c0_51 = arith.constant 0 : index
    %83 = vector.load %arg17[%c4, %c0_51] : memref<64x256xf32, #tpu.memory_space<vmem>>, vector<6x256xf32>
    %84 = arith.negf %83 : vector<6x256xf32>
    %85 = math.exp %84 : vector<6x256xf32>
    %cst_52 = arith.constant 1.000000e+00 : f32
    %86 = vector.broadcast %cst_52 : f32 to vector<6x256xf32>
    %87 = arith.addf %86, %85 : vector<6x256xf32>
    %88 = arith.divf %86, %87 : vector<6x256xf32>
    %89 = vector.extract_strided_slice %88 {offsets = [4, 0], sizes = [1, 256], strides = [1, 1]} : vector<6x256xf32> to vector<1x256xf32>
    %cst_53 = arith.constant 0.899999976 : f32
    %90 = vector.broadcast %cst_53 : f32 to vector<1x256xf32>
    %91 = arith.cmpf ogt, %89, %90 : vector<1x256xf32>
    %cst_54 = arith.constant 0.000000e+00 : f32
    %92 = vector.broadcast %cst_54 : f32 to vector<1x256xf32>
    %cst_55 = arith.constant 1.000000e+00 : f32
    %93 = vector.broadcast %cst_55 : f32 to vector<1x256xf32>
    %94 = arith.select %91, %92, %93 : vector<1x256xi1>, vector<1x256xf32>
    %95 = vector.extract_strided_slice %88 {offsets = [0, 0], sizes = [4, 256], strides = [1, 1]} : vector<6x256xf32> to vector<4x256xf32>
    %96 = vector.broadcast %94 : vector<1x256xf32> to vector<4x256xf32>
    %97 = arith.mulf %95, %96 : vector<4x256xf32>
    %98 = vector.extract_strided_slice %88 {offsets = [5, 0], sizes = [1, 256], strides = [1, 1]} : vector<6x256xf32> to vector<1x256xf32>
    %99 = arith.addf %79, %77 : vector<1x256xf32>
    %cst_56 = arith.constant 5.000000e-01 : f32
    %100 = vector.broadcast %cst_56 : f32 to vector<1x256xf32>
    %101 = arith.mulf %99, %100 : vector<1x256xf32>
    %102 = arith.addf %80, %78 : vector<1x256xf32>
    %cst_57 = arith.constant 5.000000e-01 : f32
    %103 = vector.broadcast %cst_57 : f32 to vector<1x256xf32>
    %104 = arith.mulf %102, %103 : vector<1x256xf32>
    %105 = tpu.concatenate %101, %104, %81, %82, %97, %89, %64, %98 in 0 : vector<1x256xf32>, vector<1x256xf32>, vector<1x256xf32>, vector<1x256xf32>, vector<4x256xf32>, vector<1x256xf32>, vector<4x256xf32>, vector<1x256xf32> -> vector<14x256xf32>
    %c0_58 = arith.constant 0 : index
    %c0_59 = arith.constant 0 : index
    %106 = vector.load %arg10[%c0_58, %c0_59] : memref<14x256xf32, #tpu.memory_space<vmem>>, vector<14x256xf32>
    tpu.vector_store %arg10[%c0_58, %c0_59], %105 {strides = array<i32>} : memref<14x256xf32, #tpu.memory_space<vmem>>, vector<14x256xf32>,
    %107 = vector.extract_strided_slice %97 {offsets = [0, 0], sizes = [1, 256], strides = [1, 1]} : vector<4x256xf32> to vector<1x256xf32>
    %108 = vector.extract_strided_slice %97 {offsets = [1, 0], sizes = [1, 256], strides = [1, 1]} : vector<4x256xf32> to vector<1x256xf32>
    %109 = vector.extract_strided_slice %97 {offsets = [2, 0], sizes = [1, 256], strides = [1, 1]} : vector<4x256xf32> to vector<1x256xf32>
    %110 = vector.extract_strided_slice %97 {offsets = [3, 0], sizes = [1, 256], strides = [1, 1]} : vector<4x256xf32> to vector<1x256xf32>
    %111 = arith.mulf %107, %81 : vector<1x256xf32>
    %112 = arith.addf %77, %111 : vector<1x256xf32>
    %113 = arith.mulf %109, %81 : vector<1x256xf32>
    %114 = arith.subf %79, %113 : vector<1x256xf32>
    %115 = arith.mulf %108, %82 : vector<1x256xf32>
    %116 = arith.addf %78, %115 : vector<1x256xf32>
    %117 = arith.mulf %110, %82 : vector<1x256xf32>
    %118 = arith.subf %80, %117 : vector<1x256xf32>
    %119 = arith.addf %112, %114 : vector<1x256xf32>
    %cst_60 = arith.constant 5.000000e-01 : f32
    %120 = vector.broadcast %cst_60 : f32 to vector<1x256xf32>
    %121 = arith.mulf %119, %120 : vector<1x256xf32>
    %122 = arith.addf %116, %118 : vector<1x256xf32>
    %cst_61 = arith.constant 5.000000e-01 : f32
    %123 = vector.broadcast %cst_61 : f32 to vector<1x256xf32>
    %124 = arith.mulf %122, %123 : vector<1x256xf32>
    %c28 = arith.constant 28 : index
    %c0_62 = arith.constant 0 : index
    %125 = vector.load %arg17[%c28, %c0_62] : memref<64x256xf32, #tpu.memory_space<vmem>>, vector<22x256xf32>
    %126 = arith.negf %125 : vector<22x256xf32>
    %127 = math.exp %126 : vector<22x256xf32>
    %cst_63 = arith.constant 1.000000e+00 : f32
    %128 = vector.broadcast %cst_63 : f32 to vector<22x256xf32>
    %129 = arith.addf %128, %127 : vector<22x256xf32>
    %130 = arith.divf %128, %129 : vector<22x256xf32>
    %131 = vector.extract_strided_slice %130 {offsets = [0, 0], sizes = [1, 256], strides = [1, 1]} : vector<22x256xf32> to vector<1x256xf32>
    %132 = vector.extract_strided_slice %130 {offsets = [1, 0], sizes = [1, 256], strides = [1, 1]} : vector<22x256xf32> to vector<1x256xf32>
    %133 = vector.extract_strided_slice %130 {offsets = [2, 0], sizes = [1, 256], strides = [1, 1]} : vector<22x256xf32> to vector<1x256xf32>
    %134 = vector.extract_strided_slice %130 {offsets = [3, 0], sizes = [1, 256], strides = [1, 1]} : vector<22x256xf32> to vector<1x256xf32>
    %135 = vector.extract_strided_slice %130 {offsets = [4, 0], sizes = [9, 256], strides = [1, 1]} : vector<22x256xf32> to vector<9x256xf32>
    %136 = vector.extract_strided_slice %130 {offsets = [13, 0], sizes = [9, 256], strides = [1, 1]} : vector<22x256xf32> to vector<9x256xf32>
    %cst_64 = arith.constant 0.00999999977 : f32
    %137 = vector.broadcast %cst_64 : f32 to vector<1x256xf32>
    %138 = arith.mulf %137, %81 : vector<1x256xf32>
    %139 = math.ceil %138 : vector<1x256xf32>
    %140 = arith.addf %77, %139 : vector<1x256xf32>
    %141 = arith.cmpf olt, %112, %140 : vector<1x256xf32>
    %142 = arith.subf %112, %77 : vector<1x256xf32>
    %143 = arith.mulf %131, %142 : vector<1x256xf32>
    %144 = arith.addf %77, %143 : vector<1x256xf32>
    %145 = arith.select %141, %112, %144 : vector<1x256xi1>, vector<1x256xf32>
    %146 = arith.subf %118, %78 : vector<1x256xf32>
    %147 = arith.mulf %131, %146 : vector<1x256xf32>
    %148 = arith.addf %78, %147 : vector<1x256xf32>
    %149 = arith.subf %118, %78 : vector<1x256xf32>
    %150 = arith.subf %77, %112 : vector<1x256xf32>
    %cst_65 = arith.constant 9.99999993E-9 : f32
    %151 = vector.broadcast %cst_65 : f32 to vector<1x256xf32>
    %152 = arith.addf %150, %151 : vector<1x256xf32>
    %153 = tpu.reciprocal %152 {approx = true} : vector<1x256xf32> -> vector<1x256xf32>
    %154 = arith.mulf %149, %153 : vector<1x256xf32>
    %155 = arith.subf %145, %112 : vector<1x256xf32>
    %156 = arith.mulf %154, %155 : vector<1x256xf32>
    %157 = arith.addf %156, %78 : vector<1x256xf32>
    %158 = arith.select %141, %148, %157 : vector<1x256xi1>, vector<1x256xf32>
    %159 = arith.subf %79, %139 : vector<1x256xf32>
    %160 = arith.cmpf ogt, %112, %159 : vector<1x256xf32>
    %161 = arith.subf %79, %112 : vector<1x256xf32>
    %162 = arith.mulf %132, %161 : vector<1x256xf32>
    %163 = arith.subf %79, %162 : vector<1x256xf32>
    %164 = arith.select %160, %112, %163 : vector<1x256xi1>, vector<1x256xf32>
    %165 = arith.subf %116, %78 : vector<1x256xf32>
    %166 = arith.mulf %132, %165 : vector<1x256xf32>
    %167 = arith.addf %78, %166 : vector<1x256xf32>
    %168 = arith.subf %116, %78 : vector<1x256xf32>
    %169 = arith.subf %79, %112 : vector<1x256xf32>
    %cst_66 = arith.constant 9.99999993E-9 : f32
    %170 = vector.broadcast %cst_66 : f32 to vector<1x256xf32>
    %171 = arith.addf %169, %170 : vector<1x256xf32>
    %172 = tpu.reciprocal %171 {approx = true} : vector<1x256xf32> -> vector<1x256xf32>
    %173 = arith.mulf %168, %172 : vector<1x256xf32>
    %174 = arith.subf %164, %112 : vector<1x256xf32>
    %175 = arith.mulf %173, %174 : vector<1x256xf32>
    %176 = arith.addf %175, %78 : vector<1x256xf32>
    %177 = arith.select %160, %167, %176 : vector<1x256xi1>, vector<1x256xf32>
    %178 = arith.addf %77, %139 : vector<1x256xf32>
    %179 = arith.cmpf olt, %114, %178 : vector<1x256xf32>
    %180 = arith.subf %114, %77 : vector<1x256xf32>
    %181 = arith.mulf %133, %180 : vector<1x256xf32>
    %182 = arith.addf %77, %181 : vector<1x256xf32>
    %183 = arith.select %179, %114, %182 : vector<1x256xi1>, vector<1x256xf32>
    %184 = arith.subf %80, %118 : vector<1x256xf32>
    %185 = arith.mulf %133, %184 : vector<1x256xf32>
    %186 = arith.subf %80, %185 : vector<1x256xf32>
    %187 = arith.subf %118, %80 : vector<1x256xf32>
    %188 = arith.subf %77, %114 : vector<1x256xf32>
    %cst_67 = arith.constant 9.99999993E-9 : f32
    %189 = vector.broadcast %cst_67 : f32 to vector<1x256xf32>
    %190 = arith.addf %188, %189 : vector<1x256xf32>
    %191 = tpu.reciprocal %190 {approx = true} : vector<1x256xf32> -> vector<1x256xf32>
    %192 = arith.mulf %187, %191 : vector<1x256xf32>
    %193 = arith.subf %183, %114 : vector<1x256xf32>
    %194 = arith.mulf %192, %193 : vector<1x256xf32>
    %195 = arith.addf %194, %80 : vector<1x256xf32>
    %196 = arith.select %179, %186, %195 : vector<1x256xi1>, vector<1x256xf32>
    %197 = arith.subf %79, %139 : vector<1x256xf32>
    %198 = arith.cmpf ogt, %114, %197 : vector<1x256xf32>
    %199 = arith.subf %79, %114 : vector<1x256xf32>
    %200 = arith.mulf %134, %199 : vector<1x256xf32>
    %201 = arith.subf %79, %200 : vector<1x256xf32>
    %202 = arith.select %198, %114, %201 : vector<1x256xi1>, vector<1x256xf32>
    %203 = arith.subf %80, %116 : vector<1x256xf32>
    %204 = arith.mulf %134, %203 : vector<1x256xf32>
    %205 = arith.subf %80, %204 : vector<1x256xf32>
    %206 = arith.subf %116, %80 : vector<1x256xf32>
    %207 = arith.subf %79, %114 : vector<1x256xf32>
    %cst_68 = arith.constant 9.99999993E-9 : f32
    %208 = vector.broadcast %cst_68 : f32 to vector<1x256xf32>
    %209 = arith.addf %207, %208 : vector<1x256xf32>
    %210 = tpu.reciprocal %209 {approx = true} : vector<1x256xf32> -> vector<1x256xf32>
    %211 = arith.mulf %206, %210 : vector<1x256xf32>
    %212 = arith.subf %202, %114 : vector<1x256xf32>
    %213 = arith.mulf %211, %212 : vector<1x256xf32>
    %214 = arith.addf %213, %80 : vector<1x256xf32>
    %215 = arith.select %198, %205, %214 : vector<1x256xi1>, vector<1x256xf32>
    %cst_69 = arith.constant 0.000000e+00 : f32
    %216 = vector.broadcast %cst_69 : f32 to vector<1x256xf32>
    %cst_70 = arith.constant 1.250000e-01 : f32
    %217 = vector.broadcast %cst_70 : f32 to vector<1x256xf32>
    %218 = arith.mulf %158, %217 : vector<1x256xf32>
    %cst_71 = arith.constant 1.000000e+00 : f32
    %219 = vector.broadcast %cst_71 : f32 to vector<1x256xf32>
    %220 = arith.addf %218, %219 : vector<1x256xf32>
    %221 = arith.subf %220, %38 : vector<1x256xf32>
    %cst_72 = arith.constant 1.250000e-01 : f32
    %222 = vector.broadcast %cst_72 : f32 to vector<1x256xf32>
    %223 = arith.mulf %145, %222 : vector<1x256xf32>
    %cst_73 = arith.constant 1.000000e+00 : f32
    %224 = vector.broadcast %cst_73 : f32 to vector<1x256xf32>
    %225 = arith.addf %223, %224 : vector<1x256xf32>
    %226 = arith.subf %225, %37 : vector<1x256xf32>
    %cst_74 = arith.constant 1.250000e-01 : f32
    %227 = vector.broadcast %cst_74 : f32 to vector<1x256xf32>
    %228 = arith.mulf %78, %227 : vector<1x256xf32>
    %cst_75 = arith.constant 1.000000e+00 : f32
    %229 = vector.broadcast %cst_75 : f32 to vector<1x256xf32>
    %230 = arith.addf %228, %229 : vector<1x256xf32>
    %231 = arith.subf %230, %38 : vector<1x256xf32>
    %cst_76 = arith.constant 1.250000e-01 : f32
    %232 = vector.broadcast %cst_76 : f32 to vector<1x256xf32>
    %233 = arith.mulf %112, %232 : vector<1x256xf32>
    %234 = arith.subf %233, %37 : vector<1x256xf32>
    %cst_77 = arith.constant 1.250000e-01 : f32
    %235 = vector.broadcast %cst_77 : f32 to vector<1x256xf32>
    %236 = arith.mulf %177, %235 : vector<1x256xf32>
    %cst_78 = arith.constant 1.000000e+00 : f32
    %237 = vector.broadcast %cst_78 : f32 to vector<1x256xf32>
    %238 = arith.addf %236, %237 : vector<1x256xf32>
    %239 = arith.subf %238, %38 : vector<1x256xf32>
    %cst_79 = arith.constant 1.250000e-01 : f32
    %240 = vector.broadcast %cst_79 : f32 to vector<1x256xf32>
    %241 = arith.mulf %164, %240 : vector<1x256xf32>
    %cst_80 = arith.constant 1.000000e+00 : f32
    %242 = vector.broadcast %cst_80 : f32 to vector<1x256xf32>
    %243 = arith.subf %241, %242 : vector<1x256xf32>
    %244 = arith.subf %243, %37 : vector<1x256xf32>
    %cst_81 = arith.constant 1.250000e-01 : f32
    %245 = vector.broadcast %cst_81 : f32 to vector<1x256xf32>
    %246 = arith.mulf %118, %245 : vector<1x256xf32>
    %247 = arith.subf %246, %38 : vector<1x256xf32>
    %cst_82 = arith.constant 1.250000e-01 : f32
    %248 = vector.broadcast %cst_82 : f32 to vector<1x256xf32>
    %249 = arith.mulf %77, %248 : vector<1x256xf32>
    %cst_83 = arith.constant 1.000000e+00 : f32
    %250 = vector.broadcast %cst_83 : f32 to vector<1x256xf32>
    %251 = arith.addf %249, %250 : vector<1x256xf32>
    %252 = arith.subf %251, %37 : vector<1x256xf32>
    %cst_84 = arith.constant 1.250000e-01 : f32
    %253 = vector.broadcast %cst_84 : f32 to vector<1x256xf32>
    %254 = arith.mulf %116, %253 : vector<1x256xf32>
    %255 = arith.subf %254, %38 : vector<1x256xf32>
    %cst_85 = arith.constant 1.250000e-01 : f32
    %256 = vector.broadcast %cst_85 : f32 to vector<1x256xf32>
    %257 = arith.mulf %79, %256 : vector<1x256xf32>
    %cst_86 = arith.constant 1.000000e+00 : f32
    %258 = vector.broadcast %cst_86 : f32 to vector<1x256xf32>
    %259 = arith.subf %257, %258 : vector<1x256xf32>
    %260 = arith.subf %259, %37 : vector<1x256xf32>
    %cst_87 = arith.constant 1.250000e-01 : f32
    %261 = vector.broadcast %cst_87 : f32 to vector<1x256xf32>
    %262 = arith.mulf %196, %261 : vector<1x256xf32>
    %cst_88 = arith.constant 1.000000e+00 : f32
    %263 = vector.broadcast %cst_88 : f32 to vector<1x256xf32>
    %264 = arith.subf %262, %263 : vector<1x256xf32>
    %265 = arith.subf %264, %38 : vector<1x256xf32>
    %cst_89 = arith.constant 1.250000e-01 : f32
    %266 = vector.broadcast %cst_89 : f32 to vector<1x256xf32>
    %267 = arith.mulf %183, %266 : vector<1x256xf32>
    %cst_90 = arith.constant 1.000000e+00 : f32
    %268 = vector.broadcast %cst_90 : f32 to vector<1x256xf32>
    %269 = arith.addf %267, %268 : vector<1x256xf32>
    %270 = arith.subf %269, %37 : vector<1x256xf32>
    %cst_91 = arith.constant 1.250000e-01 : f32
    %271 = vector.broadcast %cst_91 : f32 to vector<1x256xf32>
    %272 = arith.mulf %80, %271 : vector<1x256xf32>
    %cst_92 = arith.constant 1.000000e+00 : f32
    %273 = vector.broadcast %cst_92 : f32 to vector<1x256xf32>
    %274 = arith.subf %272, %273 : vector<1x256xf32>
    %275 = arith.subf %274, %38 : vector<1x256xf32>
    %cst_93 = arith.constant 1.250000e-01 : f32
    %276 = vector.broadcast %cst_93 : f32 to vector<1x256xf32>
    %277 = arith.mulf %114, %276 : vector<1x256xf32>
    %278 = arith.subf %277, %37 : vector<1x256xf32>
    %cst_94 = arith.constant 1.250000e-01 : f32
    %279 = vector.broadcast %cst_94 : f32 to vector<1x256xf32>
    %280 = arith.mulf %215, %279 : vector<1x256xf32>
    %cst_95 = arith.constant 1.000000e+00 : f32
    %281 = vector.broadcast %cst_95 : f32 to vector<1x256xf32>
    %282 = arith.subf %280, %281 : vector<1x256xf32>
    %283 = arith.subf %282, %38 : vector<1x256xf32>
    %cst_96 = arith.constant 1.250000e-01 : f32
    %284 = vector.broadcast %cst_96 : f32 to vector<1x256xf32>
    %285 = arith.mulf %202, %284 : vector<1x256xf32>
    %cst_97 = arith.constant 1.000000e+00 : f32
    %286 = vector.broadcast %cst_97 : f32 to vector<1x256xf32>
    %287 = arith.subf %285, %286 : vector<1x256xf32>
    %288 = arith.subf %287, %37 : vector<1x256xf32>
    %289 = tpu.concatenate %221, %226, %231, %234, %239, %244, %247, %252, %216, %216, %255, %260, %265, %270, %275, %278 in 0 : vector<1x256xf32>, vector<1x256xf32>, vector<1x256xf32>, vector<1x256xf32>, vector<1x256xf32>, vector<1x256xf32>, vector<1x256xf32>, vector<1x256xf32>, vector<1x256xf32>, vector<1x256xf32>, vector<1x256xf32>, vector<1x256xf32>, vector<1x256xf32>, vector<1x256xf32>, vector<1x256xf32>, vector<1x256xf32> -> vector<16x256xf32>
    %290 = tpu.concatenate %283, %288 in 0 : vector<1x256xf32>, vector<1x256xf32> -> vector<2x256xf32>
    %291 = tpu.concatenate %289, %290 in 0 : vector<16x256xf32>, vector<2x256xf32> -> vector<18x256xf32>
    %c0_98 = arith.constant 0 : index
    %c0_99 = arith.constant 0 : index
    %292 = vector.load %arg11[%c0_98, %c0_99] : memref<18x256xf32, #tpu.memory_space<vmem>>, vector<18x256xf32>
    tpu.vector_store %arg11[%c0_98, %c0_99], %291 {strides = array<i32>} : memref<18x256xf32, #tpu.memory_space<vmem>>, vector<18x256xf32>,
    %293 = arith.subf %112, %79 : vector<1x256xf32>
    %294 = arith.mulf %293, %293 : vector<1x256xf32>
    %295 = arith.subf %78, %116 : vector<1x256xf32>
    %296 = arith.mulf %295, %295 : vector<1x256xf32>
    %297 = arith.addf %294, %296 : vector<1x256xf32>
    %298 = math.sqrt %297 : vector<1x256xf32>
    %299 = arith.subf %77, %114 : vector<1x256xf32>
    %300 = arith.mulf %299, %299 : vector<1x256xf32>
    %301 = arith.subf %118, %80 : vector<1x256xf32>
    %302 = arith.mulf %301, %301 : vector<1x256xf32>
    %303 = arith.addf %300, %302 : vector<1x256xf32>
    %304 = math.sqrt %303 : vector<1x256xf32>
    %305 = arith.addf %298, %304 : vector<1x256xf32>
    %cst_100 = arith.constant 5.000000e-01 : f32
    %306 = vector.broadcast %cst_100 : f32 to vector<1x256xf32>
    %307 = arith.mulf %305, %306 : vector<1x256xf32>
    %308 = arith.subf %77, %112 : vector<1x256xf32>
    %309 = arith.mulf %308, %308 : vector<1x256xf32>
    %310 = arith.subf %118, %78 : vector<1x256xf32>
    %311 = arith.mulf %310, %310 : vector<1x256xf32>
    %312 = arith.addf %309, %311 : vector<1x256xf32>
    %313 = math.sqrt %312 : vector<1x256xf32>
    %314 = arith.subf %114, %79 : vector<1x256xf32>
    %315 = arith.mulf %314, %314 : vector<1x256xf32>
    %316 = arith.subf %80, %116 : vector<1x256xf32>
    %317 = arith.mulf %316, %316 : vector<1x256xf32>
    %318 = arith.addf %315, %317 : vector<1x256xf32>
    %319 = math.sqrt %318 : vector<1x256xf32>
    %320 = arith.addf %313, %319 : vector<1x256xf32>
    %cst_101 = arith.constant 5.000000e-01 : f32
    %321 = vector.broadcast %cst_101 : f32 to vector<1x256xf32>
    %322 = arith.mulf %320, %321 : vector<1x256xf32>
    %323 = arith.subf %116, %78 : vector<1x256xf32>
    %324 = arith.subf %79, %112 : vector<1x256xf32>
    %cst_102 = arith.constant 9.99999974E-5 : f32
    %325 = vector.broadcast %cst_102 : f32 to vector<1x256xf32>
    %326 = arith.addf %324, %325 : vector<1x256xf32>
    %327 = tpu.reciprocal %326 {approx = true} : vector<1x256xf32> -> vector<1x256xf32>
    %328 = arith.mulf %323, %327 : vector<1x256xf32>
    %329 = arith.subf %80, %118 : vector<1x256xf32>
    %330 = arith.subf %114, %77 : vector<1x256xf32>
    %cst_103 = arith.constant 9.99999974E-5 : f32
    %331 = vector.broadcast %cst_103 : f32 to vector<1x256xf32>
    %332 = arith.addf %330, %331 : vector<1x256xf32>
    %333 = tpu.reciprocal %332 {approx = true} : vector<1x256xf32> -> vector<1x256xf32>
    %334 = arith.mulf %329, %333 : vector<1x256xf32>
    %335 = arith.mulf %328, %334 : vector<1x256xf32>
    %cst_104 = arith.constant 1.000000e+00 : f32
    %336 = vector.broadcast %cst_104 : f32 to vector<1x256xf32>
    %337 = arith.subf %336, %335 : vector<1x256xf32>
    %338 = arith.mulf %328, %328 : vector<1x256xf32>
    %cst_105 = arith.constant 1.000000e+00 : f32
    %339 = vector.broadcast %cst_105 : f32 to vector<1x256xf32>
    %340 = arith.addf %339, %338 : vector<1x256xf32>
    %341 = arith.mulf %334, %334 : vector<1x256xf32>
    %cst_106 = arith.constant 1.000000e+00 : f32
    %342 = vector.broadcast %cst_106 : f32 to vector<1x256xf32>
    %343 = arith.addf %342, %341 : vector<1x256xf32>
    %344 = arith.mulf %340, %343 : vector<1x256xf32>
    %345 = math.rsqrt %344 : vector<1x256xf32>
    %346 = arith.mulf %337, %345 : vector<1x256xf32>
    %cst_107 = arith.constant 1.000000e+00 : f32
    %347 = vector.broadcast %cst_107 : f32 to vector<1x256xf32>
    %348 = arith.addf %347, %346 : vector<1x256xf32>
    %cst_108 = arith.constant 5.000000e-01 : f32
    %349 = vector.broadcast %cst_108 : f32 to vector<1x256xf32>
    %350 = arith.mulf %348, %349 : vector<1x256xf32>
    %cst_109 = arith.constant 0.000000e+00 : f32
    %351 = vector.broadcast %cst_109 : f32 to vector<1x256xf32>
    %352 = arith.maximumf %350, %351 : vector<1x256xf32>
    %353 = math.sqrt %352 : vector<1x256xf32>
    %354 = arith.addf %328, %334 : vector<1x256xf32>
    %cst_110 = arith.constant 0.000000e+00 : f32
    %355 = vector.broadcast %cst_110 : f32 to vector<1x256xf32>
    %356 = arith.cmpf oge, %354, %355 : vector<1x256xf32>
    %cst_111 = arith.constant 1.000000e+00 : f32
    %cst_112 = arith.constant -1.000000e+00 : f32
    %357 = vector.broadcast %cst_111 : f32 to vector<1x256xf32>
    %358 = vector.broadcast %cst_112 : f32 to vector<1x256xf32>
    %359 = arith.select %356, %357, %358 : vector<1x256xi1>, vector<1x256xf32>
    %cst_113 = arith.constant 1.000000e+00 : f32
    %360 = vector.broadcast %cst_113 : f32 to vector<1x256xf32>
    %361 = arith.subf %360, %346 : vector<1x256xf32>
    %cst_114 = arith.constant 5.000000e-01 : f32
    %362 = vector.broadcast %cst_114 : f32 to vector<1x256xf32>
    %363 = arith.mulf %361, %362 : vector<1x256xf32>
    %cst_115 = arith.constant 0.000000e+00 : f32
    %364 = vector.broadcast %cst_115 : f32 to vector<1x256xf32>
    %365 = arith.maximumf %363, %364 : vector<1x256xf32>
    %366 = math.sqrt %365 : vector<1x256xf32>
    %367 = arith.mulf %359, %366 : vector<1x256xf32>
    %cst_116 = arith.constant 5.000000e-01 : f32
    %368 = vector.broadcast %cst_116 : f32 to vector<1x256xf32>
    %369 = arith.mulf %307, %368 : vector<1x256xf32>
    %370 = arith.subf %121, %369 : vector<1x256xf32>
    %371 = vector.broadcast %307 : vector<1x256xf32> to vector<9x256xf32>
    %372 = arith.mulf %136, %371 : vector<9x256xf32>
    %373 = vector.broadcast %370 : vector<1x256xf32> to vector<9x256xf32>
    %374 = arith.addf %373, %372 : vector<9x256xf32>
    %cst_117 = arith.constant 5.000000e-01 : f32
    %375 = vector.broadcast %cst_117 : f32 to vector<1x256xf32>
    %376 = arith.mulf %322, %375 : vector<1x256xf32>
    %377 = arith.subf %124, %376 : vector<1x256xf32>
    %378 = vector.broadcast %322 : vector<1x256xf32> to vector<9x256xf32>
    %379 = arith.mulf %135, %378 : vector<9x256xf32>
    %380 = vector.broadcast %377 : vector<1x256xf32> to vector<9x256xf32>
    %381 = arith.addf %380, %379 : vector<9x256xf32>
    %382 = vector.broadcast %121 : vector<1x256xf32> to vector<9x256xf32>
    %383 = arith.subf %374, %382 : vector<9x256xf32>
    %384 = vector.broadcast %353 : vector<1x256xf32> to vector<9x256xf32>
    %385 = arith.mulf %384, %383 : vector<9x256xf32>
    %386 = vector.broadcast %124 : vector<1x256xf32> to vector<9x256xf32>
    %387 = arith.subf %381, %386 : vector<9x256xf32>
    %388 = vector.broadcast %367 : vector<1x256xf32> to vector<9x256xf32>
    %389 = arith.mulf %388, %387 : vector<9x256xf32>
    %390 = arith.subf %385, %389 : vector<9x256xf32>
    %391 = vector.broadcast %121 : vector<1x256xf32> to vector<9x256xf32>
    %392 = arith.addf %390, %391 : vector<9x256xf32>
    %393 = vector.broadcast %77 : vector<1x256xf32> to vector<9x256xf32>
    %394 = arith.cmpf oge, %392, %393 : vector<9x256xf32>
    %395 = vector.shape_cast %77 : vector<1x256xf32> to vector<1x256xf32>
    %396 = vector.broadcast %395 : vector<1x256xf32> to vector<9x256xf32>
    %397 = arith.select %394, %392, %396 : vector<9x256xi1>, vector<9x256xf32>
    %398 = vector.broadcast %79 : vector<1x256xf32> to vector<9x256xf32>
    %399 = arith.cmpf ole, %397, %398 : vector<9x256xf32>
    %400 = vector.shape_cast %79 : vector<1x256xf32> to vector<1x256xf32>
    %401 = vector.broadcast %400 : vector<1x256xf32> to vector<9x256xf32>
    %402 = arith.select %399, %392, %401 : vector<9x256xi1>, vector<9x256xf32>
    %403 = vector.broadcast %121 : vector<1x256xf32> to vector<9x256xf32>
    %404 = arith.subf %374, %403 : vector<9x256xf32>
    %405 = vector.broadcast %367 : vector<1x256xf32> to vector<9x256xf32>
    %406 = arith.mulf %405, %404 : vector<9x256xf32>
    %407 = vector.broadcast %124 : vector<1x256xf32> to vector<9x256xf32>
    %408 = arith.subf %381, %407 : vector<9x256xf32>
    %409 = vector.broadcast %353 : vector<1x256xf32> to vector<9x256xf32>
    %410 = arith.mulf %409, %408 : vector<9x256xf32>
    %411 = arith.addf %406, %410 : vector<9x256xf32>
    %412 = vector.broadcast %124 : vector<1x256xf32> to vector<9x256xf32>
    %413 = arith.addf %411, %412 : vector<9x256xf32>
    %414 = vector.broadcast %78 : vector<1x256xf32> to vector<9x256xf32>
    %415 = arith.cmpf oge, %413, %414 : vector<9x256xf32>
    %416 = vector.shape_cast %78 : vector<1x256xf32> to vector<1x256xf32>
    %417 = vector.broadcast %416 : vector<1x256xf32> to vector<9x256xf32>
    %418 = arith.select %415, %413, %417 : vector<9x256xi1>, vector<9x256xf32>
    %419 = vector.broadcast %80 : vector<1x256xf32> to vector<9x256xf32>
    %420 = arith.cmpf ole, %418, %419 : vector<9x256xf32>
    %421 = vector.shape_cast %80 : vector<1x256xf32> to vector<1x256xf32>
    %422 = vector.broadcast %421 : vector<1x256xf32> to vector<9x256xf32>
    %423 = arith.select %420, %413, %422 : vector<9x256xi1>, vector<9x256xf32>
    %424 = tpu.concatenate %402, %423 in 0 : vector<9x256xf32>, vector<9x256xf32> -> vector<18x256xf32>
    %c0_118 = arith.constant 0 : index
    %c0_119 = arith.constant 0 : index
    %425 = vector.load %arg13[%c0_118, %c0_119] : memref<18x256xf32, #tpu.memory_space<vmem>>, vector<18x256xf32>
    tpu.vector_store %arg13[%c0_118, %c0_119], %424 {strides = array<i32>} : memref<18x256xf32, #tpu.memory_space<vmem>>, vector<18x256xf32>,
    %cst_120 = arith.constant 1.250000e-01 : f32
    %426 = vector.broadcast %cst_120 : f32 to vector<9x256xf32>
    %427 = arith.mulf %423, %426 : vector<9x256xf32>
    %428 = vector.broadcast %38 : vector<1x256xf32> to vector<9x256xf32>
    %429 = arith.subf %427, %428 : vector<9x256xf32>
    %c0_121 = arith.constant 0 : index
    %c0_122 = arith.constant 0 : index
    %430 = vector.load %arg4[%c0_121, %c0_122] : memref<18x1xf32, #tpu.memory_space<vmem>>, vector<9x1xf32>
    %431 = vector.broadcast %430 : vector<9x1xf32> to vector<9x256xf32>
    %432 = arith.addf %429, %431 : vector<9x256xf32>
    %cst_123 = arith.constant 1.250000e-01 : f32
    %433 = vector.broadcast %cst_123 : f32 to vector<9x256xf32>
    %434 = arith.mulf %402, %433 : vector<9x256xf32>
    %435 = vector.broadcast %37 : vector<1x256xf32> to vector<9x256xf32>
    %436 = arith.subf %434, %435 : vector<9x256xf32>
    %c9 = arith.constant 9 : index
    %c0_124 = arith.constant 0 : index
    %437 = vector.load %arg4[%c9, %c0_124] : memref<18x1xf32, #tpu.memory_space<vmem>>, vector<9x1xf32>
    %438 = vector.broadcast %437 : vector<9x1xf32> to vector<9x256xf32>
    %439 = arith.addf %436, %438 : vector<9x256xf32>
    %440 = tpu.concatenate %432, %439 in 0 : vector<9x256xf32>, vector<9x256xf32> -> vector<18x256xf32>
    %c0_125 = arith.constant 0 : index
    %c0_126 = arith.constant 0 : index
    %441 = vector.load %arg12[%c0_125, %c0_126] : memref<18x256xf32, #tpu.memory_space<vmem>>, vector<18x256xf32>
    tpu.vector_store %arg12[%c0_125, %c0_126], %440 {strides = array<i32>} : memref<18x256xf32, #tpu.memory_space<vmem>>, vector<18x256xf32>,
    return
  }
  func.func @transform_0(%arg0: i32) -> (i32, i32) {
    %c0_i32 = arith.constant 0 : i32
    %c0_i32_0 = arith.constant 0 : i32
    return %c0_i32, %arg0 : i32, i32
  }
  func.func @transform_1(%arg0: i32) -> (i32, i32) {
    %c0_i32 = arith.constant 0 : i32
    %c0_i32_0 = arith.constant 0 : i32
    return %c0_i32, %arg0 : i32, i32
  }
  func.func @transform_2(%arg0: i32) -> (i32, i32) {
    %c0_i32 = arith.constant 0 : i32
    %c0_i32_0 = arith.constant 0 : i32
    %c0_i32_1 = arith.constant 0 : i32
    return %c0_i32, %c0_i32_0 : i32, i32
  }
  func.func @transform_3(%arg0: i32) -> (i32, i32) {
    %c0_i32 = arith.constant 0 : i32
    %c0_i32_0 = arith.constant 0 : i32
    %c0_i32_1 = arith.constant 0 : i32
    return %c0_i32, %c0_i32_0 : i32, i32
  }
  func.func @transform_4(%arg0: i32) -> (i32, i32, i32) {
    %c0_i32 = arith.constant 0 : i32
    %c0_i32_0 = arith.constant 0 : i32
    %c0_i32_1 = arith.constant 0 : i32
    %c0_i32_2 = arith.constant 0 : i32
    return %c0_i32, %c0_i32_0, %c0_i32_1 : i32, i32, i32
  }
  func.func @transform_5(%arg0: i32) -> (i32, i32) {
    %c0_i32 = arith.constant 0 : i32
    %c0_i32_0 = arith.constant 0 : i32
    %c0_i32_1 = arith.constant 0 : i32
    return %c0_i32, %c0_i32_0 : i32, i32
  }
  func.func @transform_6(%arg0: i32) -> (i32, i32) {
    %c0_i32 = arith.constant 0 : i32
    %c0_i32_0 = arith.constant 0 : i32
    %c0_i32_1 = arith.constant 0 : i32
    return %c0_i32, %c0_i32_0 : i32, i32
  }
  func.func @transform_7(%arg0: i32) -> (i32, i32) {
    %c0_i32 = arith.constant 0 : i32
    %c0_i32_0 = arith.constant 0 : i32
    %c0_i32_1 = arith.constant 0 : i32
    return %c0_i32, %c0_i32_0 : i32, i32
  }
  func.func @transform_8(%arg0: i32) -> (i32, i32) {
    %c0_i32 = arith.constant 0 : i32
    %c0_i32_0 = arith.constant 0 : i32
    return %c0_i32, %arg0 : i32, i32
  }
  func.func @transform_9(%arg0: i32) -> (i32, i32) {
    %c0_i32 = arith.constant 0 : i32
    %c0_i32_0 = arith.constant 0 : i32
    return %c0_i32, %arg0 : i32, i32
  }
  func.func @transform_10(%arg0: i32) -> (i32, i32) {
    %c0_i32 = arith.constant 0 : i32
    %c0_i32_0 = arith.constant 0 : i32
    return %c0_i32, %arg0 : i32, i32
  }
  func.func @transform_11(%arg0: i32) -> (i32, i32) {
    %c0_i32 = arith.constant 0 : i32
    %c0_i32_0 = arith.constant 0 : i32
    return %c0_i32, %arg0 : i32, i32
  }
  func.func @transform_12(%arg0: i32) -> (i32, i32) {
    %c0_i32 = arith.constant 0 : i32
    %c0_i32_0 = arith.constant 0 : i32
    return %c0_i32, %arg0 : i32, i32
  }
  func.func @transform_13(%arg0: i32) -> (i32, i32) {
    %c0_i32 = arith.constant 0 : i32
    %c0_i32_0 = arith.constant 0 : i32
    return %c0_i32, %arg0 : i32, i32
  }
  func.func @transform_14(%arg0: i32) -> (i32, i32) {
    %c0_i32 = arith.constant 0 : i32
    %c0_i32_0 = arith.constant 0 : i32
    return %c0_i32, %arg0 : i32, i32
  }
  func.func @transform_15(%arg0: i32) -> (i32, i32) {
    %c0_i32 = arith.constant 0 : i32
    %c0_i32_0 = arith.constant 0 : i32
    return %c0_i32, %arg0 : i32, i32
  }
}

</mosaic_0001>

<bundles_post_ra>
// kernel: tile.9
= control target key start
LH: loop header
LB: loop body
LE: loop exit
PB: predicated region body
PF: predicated region fallthrough
CT: control target
= control target key end

     0   :  { %s7_s6 = smov 3  ;;  %s21_s9 = smov 3  ;;  %vm4_vm0 = vcmask 130048   ;;  %vm11_vm1 = vcmask 1048448   ;;  %vm18_vm2 = vcmask 917248   ;;  %vm25_vm3 = vcmask 786048   ;;  %s119_s0 = inlined_call_operand.vmem [shape: f32[16,16], index: 0, kind: input, shape index: {}]   ;;  %s120_s1 = inlined_call_operand.vmem [shape: f32[256], index: 1, kind: output, shape index: {}]  }
   0x1   :  { %v61_v0 = vld [vmem:[%s119_s0 + $0x7] ss:$8 sm:%s7_s6]   ;;  %s75_s10 = smov 112   ;;  %v63_v1 = vld [vmem:[%s119_s0 + $0x5] ss:$8 sm:%s21_s9]   ;;  %s14_s13 = smov 3 }
   0x2   :  { %9 = vrot.lane.b32.xlu0 %v61_v0, %s75_s10  ;;  %s76_s14 = smov 80   ;;  %v62_v2 = vld [vmem:[%s119_s0 + $0x6] ss:$8 sm:%s14_s13]   ;;  %s28_s17 = smov 3  ;;  %vm32_vm4 = vcmask 654848   ;;  %vm39_vm5 = vcmask 523648  }
   0x3   :  { %23 = vrot.lane.b32.xlu1 %v63_v1, %s76_s14  ;;  %v64_v3 = vld [vmem:[%s119_s0 + $0x4] ss:$8 sm:%s28_s17]   ;;  %s35_s20 = smov 3  ;;  %s42_s21 = smov 3  ;;  %vm46_vm6 = vcmask 392448   ;;  %vm53_vm7 = vcmask 261248  }
   0x4   :  { %s77_s22 = smov 96   ;;  %s78_s23 = smov 64   ;;  %v65_v4 = vld [vmem:[%s119_s0 + $0x3] ss:$8 sm:%s35_s20]   ;;  %v66_v5 = vld [vmem:[%s119_s0 + $0x2] ss:$8 sm:%s42_s21]  }
   0x5   :  { %s2_s26 = smov 3  ;;  %s49_s29 = smov 3 }
   0x6   :  { %16 = vrot.lane.b32.xlu0 %v62_v2, %s77_s22  ;;  %v3_v6 = vld [vmem:[%s119_s0] ss:$8 sm:%s2_s26]   ;;  %s79_s3 = smov 48   ;;  %s80_s4 = smov 32  }
   0x7   :  { %30 = vrot.lane.b32.xlu1 %v64_v3, %s78_s23  ;;  %5 = vst.msk [vmem:[#allocation0] sm:$0x3] %vm4_vm0, %v3_v6   ;;  %v67_v7 = vld [vmem:[%s119_s0 + $0x1] ss:$8 sm:%s49_s29]   ;;  %s81_s0 = smov 16  }
   0xa   :  { %37 = vrot.lane.b32.xlu0 %v65_v4, %s79_s3 }
   0xb   :  { %44 = vrot.lane.b32.xlu1 %v66_v5, %s80_s4 }
   0xe   :  { %51 = vrot.lane.b32.xlu0 %v67_v7, %s81_s0 }
  0x74   :  { %v10_v8 = vpop.permute.xlu0 %9  }
  0x75   :  { %12 = vst.msk [vmem:[#allocation0] sm:$0x3] %vm11_vm1, %v10_v8   ;;  %v24_v9 = vpop.permute.xlu1 %23  }
  0x78   :  { %v17_v10 = vpop.permute.xlu0 %16  }
  0x79   :  { %19 = vst.msk [vmem:[#allocation0] sm:$0x3] %vm18_vm2, %v17_v10   ;;  %v31_v11 = vpop.permute.xlu1 %30  }
  0x7a   :  { %26 = vst.msk [vmem:[#allocation0] sm:$0x3] %vm25_vm3, %v24_v9  }
  0x7b   :  { %33 = vst.msk [vmem:[#allocation0] sm:$0x3] %vm32_vm4, %v31_v11  }
  0x7c   :  { %v38_v12 = vpop.permute.xlu0 %37  }
  0x7d   :  { %40 = vst.msk [vmem:[#allocation0] sm:$0x3] %vm39_vm5, %v38_v12   ;;  %v45_v13 = vpop.permute.xlu1 %44  }
  0x7e   :  { %47 = vst.msk [vmem:[#allocation0] sm:$0x3] %vm46_vm6, %v45_v13  }
  0x80   :  { %v52_v14 = vpop.permute.xlu0 %51  }
  0x81   :  { %54 = vst.msk [vmem:[#allocation0] sm:$0x3] %vm53_vm7, %v52_v14  }
  0x88   :  { %v58_v15 = vld [vmem:[#allocation0] sm:$0x3] }
  0x89   :  { %60 = vst [vmem:[%s120_s1] sm:$0x3] %v58_v15 }

// kernel: head1_forward.1
= control target key start
LH: loop header
LB: loop body
LE: loop exit
PB: predicated region body
PF: predicated region fallthrough
CT: control target
= control target key end

     0   :  { %s4718_s0 = inlined_call_operand.vmem [shape: bf16[18,512], index: 0, kind: input, shape index: {}]   ;;  %s4719_s1 = inlined_call_operand.vmem [shape: f32[2,512], index: 1, kind: input, shape index: {}]   ;;  %s4720_s2 = inlined_call_operand.vmem [shape: f32[2,256], index: 2, kind: input, shape index: {}]   ;;  %s4721_s3 = inlined_call_operand.vmem [shape: f32[18,1], index: 3, kind: input, shape index: {}]   ;;  %s4722_s4 = inlined_call_operand.vmem [shape: bf16[3,8,18], index: 4, kind: input, shape index: {}]   ;;  %s4723_s5 = inlined_call_operand.vmem [shape: f32[8,1], index: 5, kind: input, shape index: {}]   ;;  %s4724_s6 = inlined_call_operand.vmem [shape: bf16[64,8], index: 6, kind: input, shape index: {}]   ;;  %s4725_s7 = inlined_call_operand.vmem [shape: f32[64,1], index: 7, kind: input, shape index: {}]   ;;  %s4726_s8 = inlined_call_operand.vmem [shape: f32[10,512], index: 8, kind: output, shape index: {0}]   ;;  %s4727_s9 = inlined_call_operand.vmem [shape: f32[14,512], index: 9, kind: output, shape index: {1}]   ;;  %s4728_s10 = inlined_call_operand.vmem [shape: f32[18,512], index: 10, kind: output, shape index: {2}]   ;;  %s4729_s11 = inlined_call_operand.vmem [shape: f32[18,512], index: 11, kind: output, shape index: {3}]   ;;  %s4730_s12 = inlined_call_operand.hbm [shape: f32[18,512], index: 12, kind: output, shape index: {4}]   ;;  %s4731_s13 = inlined_call_operand.vmem [shape: f32[9,512], index: 13, kind: output, shape index: {5}]   ;;  %s4732_s14 = inlined_call_operand.vmem [shape: f32[9,512], index: 14, kind: output, shape index: {6}]   ;;  %s4733_s15 = inlined_call_operand.vmem [shape: f32[8,512], index: 15, kind: output, shape index: {7}]  }
   0x1   :  { %4758 = sst [smem:[#allocation38_spill]] %s4718_s0 }
   0x2   :  { %4759 = sst [smem:[#allocation39_spill]] %s4719_s1 }
   0x3   :  { %4760 = sst [smem:[#allocation40_spill]] %s4720_s2 }
   0x4   :  { %4761 = sst [smem:[#allocation41_spill]] %s4721_s3 }
   0x5   :  { %4762 = sst [smem:[#allocation42_spill]] %s4722_s4 }
   0x6   :  { %4763 = sst [smem:[#allocation43_spill]] %s4723_s5 }
   0x7   :  { %21 = vsyncpa [#allocation9], 0 }
   0x8   :  { %23 = vsyncpa [#allocation9 + $0x1], 0  ;;  %s3468_s18 = smov 0   ;;  %s3470_s19 = smov 0  }
   0x9   :  { %s3472_s20 = smov 0   ;;  %s3474_s21 = smov 0  }
   0xa LB: > { %4764 = sst [smem:[#allocation13_spill]] %s3372_s20  ;;  %s3489_s22 = sadd.s32 4294967295, %s3376_s21   ;;  %s3376_s21 = sphi %s3474_s21, %s4834_s21   ;;  %s3372_s20 = sphi %s3472_s20, %s4831_s20   ;;  %s3368_s19 = sphi %s3470_s19, %s4833_s19   ;;  %s3364_s18 = sphi %s3468_s18, %s4832_s18  }
   0xb   : > { %s3051_s23 = sadd.s32 4294967294, %s3376_s21   ;;  %s3493_s24 = sadd.s32 1, %s3376_s21  }
   0xc   : > { %s36_s25 = sadd.s32 1, %s3372_s20  ;;  %s33_s26 = ssub.s32 %s3376_s21, %s3493_s24 }
   0xd   : > { %p43_p0 = scmp.ne.s32.totalorder %s3372_s20, %s3368_s19  ;;  %p34_p1 = scmp.eq.s32.totalorder %s33_s26, 0 }
   0xe   : > { %p44_p2 = scmp.eq.s32.totalorder %s3376_s21, 0  ;;  %p225_p3 = scmp.eq.s32.totalorder %s3489_s22, 1 }
   0xf   : > { %p334_p4 = scmp.ne.s32.totalorder %s3368_s19, %s3364_s18  ;;  %p335_p7 = scmp.eq.s32.totalorder %s3051_s23, 1 }
  0x10   : > { %s3505_s27 = scalar_select %p34_p1, %s3372_s20, %s36_s25  }
  0x11   : > { %p45_p5 = por %p44_p2, %p43_p0  ;;  %p3507_p6 = por %p225_p3, %p43_p0 }
  0x12   : > { %4765 = sst [smem:[#allocation14_spill]] %s3505_s27  ;;  %p3511_p8 = por %p335_p7, %p334_p4 }
  0x13   : > { %p3053_p9 = scmp.ge.s32.totalorder %s3376_s21, 2 }
  0x15   : > { %447 = sbr.rel (%p3053_p9) target bundleno = 40 (0x28), region = 40 }
  0x1c   : > { %450 = sbr.rel (!%p45_p5) target bundleno = 40 (0x28), region = 44  ;;  %s452_s30 = sand.u32 (%p45_p5), 1, %s3372_s20  }
  0x1d   : > { %s3132_s16 = sshll.u32 (%p45_p5), %s3376_s21, 3  ;;  %s3140_s17 = smul.u32 (%p45_p5), 24, %s452_s30 }
  0x1e   : > { %s4768_s0 = sld [smem:[#allocation38_spill]] (%p45_p5) }
  0x1f   : > { %s454_s23 = scalar_lea.vmem (%p45_p5), [#allocation3], %s3140_s17 }
  0x24   : > { %s457_s27 = scalar_lea.vmem %s4768_s0, %s3132_s16 }
  0x25   : > { %v489_v0 = vld [vmem:[%s457_s27] sm:$0xff]  ;;  %v491_v1 = vld [vmem:[%s457_s27 + $0x10] sm:$0xff] }
  0x26   : > { %v493_v2 = vld [vmem:[%s457_s27 + $0x20] sm:$0xff]  ;;  %490 = vst [vmem:[%s454_s23] sm:$0xff] %v489_v0  ;;  %492 = vst [vmem:[%s454_s23 + $0x8] sm:$0xff] %v491_v1 }
  0x27   : > { %494 = vst [vmem:[%s454_s23 + $0x10] sm:$0xff] %v493_v2 }
  0x28 PF: > { %p3056_p10 = scmp.ge.s32.totalorder %s3376_s21, 1  ;;  %p508_p11 = scmp.lt.s32.totalorder %s3376_s21, 3 }
  0x2a   : > { %p509_p12 = pnand %p3056_p10, %p508_p11 }
  0x2c   : > { %512 = sbr.rel (%p509_p12) target bundleno = 962 (0x3c2), region = 86 }
  0x33   : > { %s3526_s30 = sand.u32 1, %s3368_s19   ;;  %v3378_v3 = vmov 0   ;;  %vm640_vm0 = vcmask 1040384   ;;  %s4769_s4 = sld [smem:[#allocation42_spill]]  ;;  %vm636_vm1 = vcmask 146432   ;;  %v854_v25 = vld [vmem:[%s4725_s7 + $0x8] sm:$0xff]  ;;  %v787_v38 = vlaneseq }
  0x34   : > { %s3141_s16 = smul.u32 24, %s3526_s30  ;;  %679 = vmatprep.mubr.bf16.mxu0 %v3378_v3  ;;  %3191 = vset.pattern.permute.xlu1 %v3378_v3  ;;  %s4770_s5 = sld [smem:[#allocation43_spill]]  ;;  %v853_v27 = vld [vmem:[%s4725_s7] sm:$0xff]  ;;  %v859_v28 = vld [vmem:[%s4725_s7 + $0x30] sm:$0xff]  ;;  %v856_v29 = vld [vmem:[%s4725_s7 + $0x18] sm:$0xff]  ;;  %vm934_vm6 = vcmask 1043456  }
  0x35   : > { %3192 = vset.pattern.permute.xlu0 %v3378_v3  ;;  %973 = vmatprep.mubr.bf16.mxu1 %v3378_v3  ;;  %s3379_s26 = smov 1   ;;  %s3380_s23 = smov 127   ;;  %v860_v30 = vld [vmem:[%s4725_s7 + $0x38] sm:$0xff]  ;;  %v858_v31 = vld [vmem:[%s4725_s7 + $0x28] sm:$0xff]  ;;  %v857_v32 = vld [vmem:[%s4725_s7 + $0x20] sm:$0xff]  ;;  %v3587_v40 = vshrl.u32 %v787_v38, 7 }
  0x36   : > { %s517_s27 = scalar_lea.vmem [#allocation3], %s3141_s16  ;;  %s4771_s3 = sld [smem:[#allocation41_spill]]  ;;  %v855_v34 = vld [vmem:[%s4725_s7 + $0x10] sm:$0xff]  ;;  %v788_v41 = vand.u32 127, %v787_v38  ;;  %vm921_vm7 = vcmask 64512   ;;  %vm1104_vm8 = vcmask 1044480  }
  0x37   : > { %v3193_v4 = vld [vmem:[%s517_s27 + $0x4] ss:$8 sps:$4 sm:$0xff]   ;;  %v3195_v5 = vld [vmem:[%s517_s27] ss:$8 sps:$4 sm:$0xff]   ;;  %v619_v6 = vld [vmem:[%s517_s27 + $0x10] sm:$0x11] }
  0x38   : > { %647 = vmatprep.subr.bf16.mxu0 %v3193_v4  ;;  %v3068_v7 = vcombine.high %v619_v6, %v619_v6  ;;  %v3067_v8 = vcombine.low %v619_v6, %v619_v6  ;;  %v3590_v42 = vsub.s32 0, %v3587_v40  ;;  %v3593_v43 = vsub.s32 1, %v3587_v40  ;;  %s4772_s2 = sld [smem:[#allocation40_spill]]  ;;  %s4774_s1 = sld [smem:[#allocation39_spill]] }
  0x39   : > { %648 = vmatpush1.bf16.msra.mxu0 %v3195_v5  ;;  %v620_v10 = vld [vmem:[%s4769_s4] sm:$0xf]  ;;  %v3071_v11 = vld [vmem:[%s4769_s4 + $0x4] sm:$0xf]  ;;  %v3074_v12 = vld [vmem:[%s4769_s4 + $0x8] sm:$0xf] }
  0x3a   : > { %3069 = vmatprep.subr.msk.bf16.mxu0 %vm640_vm0, %v3068_v7  ;;  %v642_v9 = vsel %vm640_vm0, %v3067_v8, 0  ;;  %v829_v13 = vld [vmem:[%s4770_s5] sm:$0xff]  ;;  %vm789_vm2 = vcmp.lt.s32.totalorder %v788_v41, 1  ;;  %vm811_vm3 = vcmp.lt.s32.totalorder %v788_v41, 127  ;;  %s3061_s4 = sshll.u32 %s3489_s22, 1  ;;  %s3634_s5 = sshll.u32 %s3526_s30, 5 }
  0x3b   : > { %832 = vperm.xlu1 %3191, %v829_v13   ;;  %v3199_v13 = vld [vmem:[%s4724_s6 + $0x8] sm:$0xff]   ;;  %p598_p13 = scmp.lt.s32.totalorder %s3061_s4, 3  ;;  %s3641_s20 = scalar_lea.vmem [#allocation4], %s3634_s5  ;;  %vm4757_vm9 = vcmask 1047554   ;;  %vm1125_vm10 = vcmask 1041408   ;;  %vm1087_vm12 = vcmask 1045504  }
  0x3c   : > { %v2470_v33 = vld [vmem:[%s4771_s3] sm:$0xff]  ;;  %v2508_v35 = vld [vmem:[%s4771_s3 + $0x9] sm:$0xff]  ;;  %v2471_v36 = vld [vmem:[%s4771_s3 + $0x8] sm:$0x1]  ;;  %s3787_s25 = scalar_lea.vmem [#allocation5], %s3634_s5  ;;  %vm1342_vm14 = vcmask 1042432  }
  0x3d   : > { %650 = vmatpush1.bf16.msra.mxu0 %v642_v9  ;;  %v2509_v37 = vld [vmem:[%s4771_s3 + $0x11] sm:$0x1]  ;;  %s4836_s4 = smov (!%p598_p13, %s3061_s4), 3  ;;  %s3866_s0 = scalar_lea.vmem [#allocation10], %s3634_s5 }
  0x3e   : > { %693 = vmatprep.subr.bf16.mxu0 %v3193_v4  ;;  %v780_v44 = vld [vmem:[%s4772_s2] ss:$2 sm:$0x3]  ;;  %v3077_v51 = vld [vmem:[%s4772_s2 + $0x1] ss:$2 sm:$0x3] }
  0x3f   : > { %v796_v47 = vrot.slane %v780_v44, %v3590_v42  ;;  %v800_v48 = vrot.slane %v780_v44, %v3593_v43  ;;  %v818_v54 = vrot.slane %v3077_v51, %v3590_v42  ;;  %v822_v55 = vrot.slane %v3077_v51, %v3593_v43  ;;  %s3064_s16 = sshll.u32 %s4836_s4, 3 }
  0x40   : > { %3070 = vmatmul.mubr.msk.bf16.vlgmr.msra.gmra.mrb[0].mxu0 %vm636_vm1, %v620_v10 }
  0x41   : > { %694 = vmatpush1.bf16.msra.mxu0 %v3195_v5  ;;  %725 = vmatprep.mubr.bf16.mxu0 %v3378_v3 }
  0x42   : > { %3072 = vmatprep.subr.msk.bf16.mxu0 %vm640_vm0, %v3068_v7 }
  0x45   : > { %696 = vmatpush1.bf16.msra.mxu0 %v642_v9 }
  0x46   : > { %739 = vmatprep.subr.bf16.mxu0 %v3193_v4 }
  0x48   : > { %3073 = vmatmul.mubr.msk.bf16.vlgmr.msra.gmra.mrb[4].mxu0 %vm636_vm1, %v3071_v11 }
  0x49   : > { %740 = vmatpush1.bf16.msra.mxu0 %v3195_v5  ;;  %771 = vmatprep.mubr.bf16.mxu0 %v3378_v3 }
  0x4a   : > { %3075 = vmatprep.subr.msk.bf16.mxu0 %vm640_vm0, %v3068_v7 }
  0x4d   : > { %742 = vmatpush1.bf16.msra.mxu0 %v642_v9 }
  0x50   : > { %3076 = vmatmul.mubr.msk.bf16.vlgmr.msra.gmra.mrb[8].mxu0 %vm636_vm1, %v3074_v12  ;;  %v3198_v12 = vld [vmem:[%s4724_s6] sm:$0xff]  }
  0xba   : > { %v833_v46 = vpop.permute.xlu1 %832 }
 0x113   : > { %v681_v14 = vpop.f32.mrb[0].mxu0 }
 0x114   : > { %783 = vrot.lane.b32.xlu0 %v681_v14, %s3379_s26  ;;  %v683_v15 = vpop.f32.mrb[1].mxu0  ;;  %v3200_v14 = vld [vmem:[%s4724_s6 + $0x10] sm:$0xff]  }
 0x115   : > { %v685_v16 = vpop.f32.mrb[2].mxu0 }
 0x116   : > { %v686_v17 = vpop.f32.mrb[3].mxu0 }
 0x118   : > { %785 = vrot.lane.b32.xlu0 %v683_v15, %s3379_s26  ;;  %v3201_v15 = vld [vmem:[%s4724_s6 + $0x18] sm:$0xff]   ;;  %s3876_s26 = scalar_lea.vmem [#allocation11], %s3634_s5  ;;  %s4113_s5 = smul.u32 48, %s3526_s30 }
 0x11b   : > { %v727_v18 = vpop.f32.mrb[4].mxu0 }
 0x11c   : > { %v729_v19 = vpop.f32.mrb[5].mxu0 }
 0x11d   : > { %v731_v20 = vpop.f32.mrb[6].mxu0 }
 0x11e   : > { %v732_v21 = vpop.f32.mrb[7].mxu0 }
 0x123   : > { %v773_v22 = vpop.f32.mrb[8].mxu0 }
 0x124   : > { %807 = vrot.lane.b32.xlu1 %v773_v22, %s3380_s23  ;;  %v775_v23 = vpop.f32.mrb[9].mxu0 }
 0x125   : > { %809 = vrot.lane.b32.xlu0 %v775_v23, %s3380_s23  ;;  %v777_v24 = vpop.f32.mrb[10].mxu0  ;;  %s3062_s23 = sshll.u32 %s4836_s4, 1  ;;  %s3133_s4 = sshll.u32 (%p3507_p6), %s3489_s22, 4 }
 0x126   : > { %v778_v26 = vpop.f32.mrb[11].mxu0  ;;  %s3649_s17 = scalar_lea.vmem %s4774_s1, %s3062_s23  ;;  %s4138_s23 = scalar_lea.vmem [#allocation6], %s4113_s5 }
 0x127   : > { %v3662_v51 = vld [vmem:[%s3649_s17 + $0x1] ss:$2 sm:$0x3]  ;;  %s4281_s1 = scalar_lea.vmem %s4733_s15, %s3064_s16  ;;  %s4460_s16 = scalar_lea.vmem [#allocation7], %s4113_s5 }
 0x128   : > { %868 = vperm.xlu1 %3191, %v854_v25   ;;  %s2588_s3 = scalar_lea.vmem (%p3507_p6), %s4726_s8, %s3133_s4 }
 0x129   : > { %863 = vperm.xlu0 %3192, %v853_v27  }
 0x12c   : > { %893 = vperm.xlu1 %3191, %v859_v28  }
 0x12d   : > { %878 = vperm.xlu0 %3192, %v856_v29  }
 0x130   : > { %898 = vperm.xlu1 %3191, %v860_v30  }
 0x131   : > { %888 = vperm.xlu0 %3192, %v858_v31  }
 0x134   : > { %883 = vperm.xlu1 %3191, %v857_v32   ;;  %v3381_v32 = vmov 1966171168  }
 0x135   : > { %2474 = vperm.xlu0 %3192, %v2470_v33   ;;  %v1213_v33 = vunpack.c.l.s4 %v3381_v32 }
 0x138   : > { %873 = vperm.xlu1 %3191, %v855_v34  }
 0x139   : > { %2512 = vperm.xlu0 %3192, %v2508_v35  }
 0x13c   : > { %2478 = vperm.xlu1 %3191, %v2471_v36  }
 0x140   : > { %2516 = vperm.xlu1 %3191, %v2509_v37   ;;  %v1214_v37 = vunpack.c.0.s8 %v1213_v33 }
 0x186   : > { %v784_v39 = vpop.permute.xlu0 %783 }
 0x18a   : > { %v786_v45 = vpop.permute.xlu0 %785 }
 0x18b   : > { %v790_v49 = vsel %vm789_vm2, %v784_v39, %v786_v45  ;;  %v791_v50 = vsel %vm789_vm2, %v786_v45, %v784_v39 }
 0x18c   : > { %v803_v52 = vmul.f32 %v796_v47, %v791_v50  ;;  %v804_v53 = vmul.f32 %v800_v48, %v790_v49  ;;  %v3659_v50 = vld [vmem:[%s3649_s17] ss:$2 sm:$0x3] }
 0x18e   : > { %v805_v60 = vadd.f32 %v803_v52, %v727_v18  ;;  %v806_v61 = vadd.f32 %v804_v53, %v729_v19 }
 0x196   : > { %v808_v56 = vpop.permute.xlu1 %807 }
 0x197   : > { %v810_v57 = vpop.permute.xlu0 %809 }
 0x198   : > { %v812_v58 = vsel %vm811_vm3, %v808_v56, %v810_v57  ;;  %v813_v59 = vsel %vm811_vm3, %v810_v57, %v808_v56 }
 0x199   : > { %v825_v62 = vmul.f32 %v818_v54, %v812_v58  ;;  %v826_v63 = vmul.f32 %v822_v55, %v813_v59 }
 0x19b   : > { %v827_v0 = vadd.f32 %v825_v62, %v805_v60  ;;  %v828_v1 = vadd.f32 %v826_v63, %v806_v61  ;;  %v3666_v63 = vsub.s32 %v1214_v37, %v3587_v40  ;;  %v1205_v40 = vmul.f32 8.0, %v3659_v50 }
 0x19d   : > { %v835_v2 = vadd.f32 %v833_v46, %v827_v0  ;;  %v836_v4 = vadd.f32 %v833_v46, %v828_v1 }
 0x19f   : > { %vm838_vm4 = vcmp.gt.f32.partialorder %v836_v4, 0.0  ;;  %v840_v5 = vmul.f32 0.1, %v836_v4  ;;  %vm837_vm5 = vcmp.gt.f32.partialorder %v835_v2, 0.0  ;;  %v839_v6 = vmul.f32 0.1, %v835_v2 }
 0x1a1   : > { %v842_v7 = vsel %vm838_vm4, %v836_v4, %v840_v5  ;;  %v841_v8 = vsel %vm837_vm5, %v835_v2, %v839_v6 }
 0x1a2   : > { %v852_v9 = vpack.c.bf16 %v842_v7, %v842_v7  ;;  %v851_v10 = vpack.c.bf16 %v841_v8, %v841_v8 }
 0x1a4   : > { %3082 = vmatprep.subr.msk.bf16.mxu1 %vm934_vm6, %v852_v9  ;;  %v936_v11 = vsel %vm934_vm6, %v851_v10, 0  ;;  %v1207_v10 = vmul.f32 8.0, %v3662_v51 }
 0x1a5   : > { %942 = vmatpush1.bf16.msra.mxu1 %v936_v11 }
 0x1a7   : > { %v869_v16 = vpop.permute.xlu1 %868 }
 0x1a8   : > { %3083 = vmatmul.mubr.msk.bf16.vlgmr.msra.gmra.mrb[0].mxu1 %vm921_vm7, %v3198_v12  ;;  %v864_v18 = vpop.permute.xlu0 %863 }
 0x1a9   : > { %983 = vmatprep.mubr.bf16.mxu1 %v3378_v3 }
 0x1ab   : > { %v3622_v17 = vpop.permute.xlu1 %893 }
 0x1ac   : > { %v3626_v20 = vpop.permute.xlu0 %878 }
 0x1af   : > { %v3624_v19 = vpop.permute.xlu1 %898 }
 0x1b0   : > { %3084 = vmatmul.mubr.msk.bf16.gmra.mrb[4].mxu1 %vm921_vm7, %v3199_v13  ;;  %4773 = vst [vmem:[#allocation15_spill] sm:$0xff] %v3624_v19  ;;  %v3631_v22 = vpop.permute.xlu0 %888 }
 0x1b1   : > { %993 = vmatprep.mubr.bf16.mxu1 %v3378_v3 }
 0x1b3   : > { %v3628_v21 = vpop.permute.xlu1 %883 }
 0x1b7   : > { %v874_v23 = vpop.permute.xlu1 %873 }
 0x1b8   : > { %3085 = vmatmul.mubr.msk.bf16.gmra.mrb[8].mxu1 %vm921_vm7, %v3200_v14 }
 0x1b9   : > { %1003 = vmatprep.mubr.bf16.mxu1 %v3378_v3  ;;  %v2475_v3 = vpop.permute.xlu0 %2474 }
 0x1ba   : > { %v3652_v41 = vrot.slane %v2475_v3, 7 }
 0x1bb   : > { %v3638_v25 = vpop.permute.xlu1 %2478 }
 0x1bc   : > { %v2481_v39 = vrot.slane %v3638_v25, 7  ;;  %4775 = vst [vmem:[#allocation16_spill] sm:$0xff] %v3652_v41 }
 0x1bd   : > { %v2513_v35 = vpop.permute.xlu0 %2512 }
 0x1be   : > { %v3654_v44 = vrot.slane %v2513_v35, 7 }
 0x1bf   : > { %v2517_v36 = vpop.permute.xlu1 %2516 }
 0x1c0   : > { %3086 = vmatmul.mubr.msk.bf16.gmra.mrb[12].mxu1 %vm921_vm7, %v3201_v15  ;;  %4776 = vst [vmem:[#allocation17_spill] sm:$0xff] %v3654_v44  ;;  %v2519_v47 = vrot.slane %v2517_v36, 7 }
 0x1c2   : > { %v3697_v25 = vsel %vm640_vm0, %v3654_v44, %v2519_v47 }
 0x1c3   : > { %4778 = vst [vmem:[#allocation19_spill] sm:$0xff] %v3697_v25 }
 0x27b   : > { %v975_v24 = vpop.f32.mrb[0].mxu1 }
 0x27c   : > { %v976_v26 = vadd.f32 %v975_v24, %v864_v18  ;;  %v977_v27 = vpop.f32.mrb[1].mxu1 }
 0x27d   : > { %v978_v28 = vadd.f32 %v977_v27, %v864_v18  ;;  %v979_v29 = vpop.f32.mrb[2].mxu1  ;;  %v1208_v27 = vadd.f32 4.0, %v1207_v10 }
 0x27e   : > { %1014 = vst [vmem:[#allocation2] sm:$0xff] %v976_v26  ;;  %1034 = vst [vmem:[%s3641_s20] sm:$0xff] %v976_v26  ;;  %v980_v30 = vadd.f32 %v979_v29, %v869_v16  ;;  %v981_v31 = vpop.f32.mrb[3].mxu1  ;;  %v1206_v26 = vadd.f32 4.0, %v1205_v40 }
 0x27f   : > { %1015 = vst [vmem:[#allocation2 + $0x8] sm:$0xff] %v978_v28  ;;  %1035 = vst [vmem:[%s3641_s20 + $0x8] sm:$0xff] %v978_v28  ;;  %v982_v34 = vadd.f32 %v981_v31, %v869_v16  ;;  %v3686_v16 = vsel %vm640_vm0, %v3652_v41, %v2481_v39 }
 0x280   : > { %1016 = vst [vmem:[#allocation2 + $0x10] sm:$0xff] %v980_v30  ;;  %4777 = vst [vmem:[#allocation18_spill] sm:$0xff] %v3686_v16 }
 0x281   : > { %1017 = vst [vmem:[#allocation2 + $0x18] sm:$0xff] %v982_v34 }
 0x283   : > { %v985_v38 = vpop.f32.mrb[4].mxu1 }
 0x284   : > { %v3656_v45 = vadd.f32 %v985_v38, %v874_v23  ;;  %v987_v46 = vpop.f32.mrb[5].mxu1 }
 0x285   : > { %v1199_v48 = vld [vmem:[#allocation2] sm:$0xf]  ;;  %v1250_v49 = vld [vmem:[#allocation2] sm:$0xf0]  ;;  %v988_v52 = vadd.f32 %v987_v46, %v874_v23  ;;  %v989_v53 = vpop.f32.mrb[6].mxu1 }
 0x286   : > { %v1201_v54 = vmul.f32 %v1199_v48, %v1199_v48  ;;  %v3094_v55 = vmul.f32 -1.442695, %v1250_v49  ;;  %v1200_v56 = vld [vmem:[#allocation2 + $0x8] sm:$0xf]  ;;  %v1251_v57 = vld [vmem:[#allocation2 + $0x8] sm:$0xf0]  ;;  %v990_v58 = vadd.f32 %v989_v53, %v3626_v20 }
 0x287   : > { %v1202_v59 = vmul.f32 %v1200_v56, %v1200_v56  ;;  %v3095_v60 = vmul.f32 -1.442695, %v1251_v57  ;;  %v1032_v61 = vld [vmem:[#allocation2 + $0x10] sm:$0x3]  ;;  %v1041_v62 = vld [vmem:[#allocation2 + $0x10] sm:$0xfc] }
 0x288   : > { %v3668_v0 = vmul.f32 8.0, %v1201_v54  ;;  %3202 = vpow2.f32 %v3094_v55  ;;  %1036 = vst [vmem:[%s3641_s20 + $0x10] sm:$0x3] %v1032_v61  ;;  %v3088_v1 = vmul.f32 -1.442695, %v1041_v62  ;;  %1020 = vst [vmem:[#allocation2 + $0x30] sm:$0xff] %v990_v58 }
 0x289   : > { %v1252_v2 = vld [vmem:[#allocation2 + $0x10] sm:$0x3]  ;;  %v991_v4 = vpop.f32.mrb[7].mxu1  ;;  %v3671_v5 = vmul.f32 8.0, %v1202_v59  ;;  %3204 = vpow2.f32 %v3095_v60  ;;  %v1033_v7 = vld [vmem:[#allocation2 + $0x18] sm:$0x3] }
 0x28a   : > { %v3096_v6 = vmul.f32 -1.442695, %v1252_v2  ;;  %v992_v8 = vadd.f32 %v991_v4, %v3626_v20  ;;  %v1244_v9 = vrot.slane %v3668_v0, 2  ;;  %3206 = vpow2.f32 %v3088_v1  ;;  %1037 = vst [vmem:[%s3641_s20 + $0x18] sm:$0x3] %v1033_v7 }
 0x28b   : > { %v1211_v11 = vcombine.low %v3668_v0, %v3671_v5  ;;  %v1245_v12 = vrot.slane %v3671_v5, 2  ;;  %v1042_v13 = vld [vmem:[#allocation2 + $0x18] sm:$0xfc]  ;;  %v995_v14 = vpop.f32.mrb[8].mxu1  ;;  %v1253_v23 = vld [vmem:[#allocation2 + $0x18] sm:$0x3] }
 0x28c   : > { %3208 = vpow2.f32 %v3096_v6  ;;  %1021 = vst [vmem:[#allocation2 + $0x38] sm:$0xff] %v992_v8  ;;  %v3682_v15 = vadd.f32 %v1244_v9, %v3668_v0  ;;  %v3693_v3 = vadd.f32 %v995_v14, %v3628_v21  ;;  %v997_v24 = vpop.f32.mrb[9].mxu1  ;;  %v3089_v28 = vmul.f32 -1.442695, %v1042_v13 }
 0x28d   : > { %v1218_v18 = vrot.slane %v1211_v11, %v3666_v63  ;;  %v3690_v20 = vadd.f32 %v1245_v12, %v3671_v5  ;;  %v999_v29 = vpop.f32.mrb[10].mxu1  ;;  %v1328_v33 = vrot.slane %v3668_v0, 7  ;;  %v1329_v34 = vrot.slane %v3671_v5, 7 }
 0x28e   : > { %v1499_v30 = vmul.f32 0.01, %v3682_v15  ;;  %v1001_v32 = vpop.f32.mrb[11].mxu1  ;;  %v3097_v36 = vmul.f32 -1.442695, %v1253_v23  ;;  %3210 = vpow2.f32 %v3089_v28  ;;  %v4735_v56 = vrot.slane %v3682_v15, 5 }
 0x28f   : > { %v1219_v31 = vcombine.high %v1218_v18, %v1218_v18  ;;  %v1500_v35 = vmul.f32 0.01, %v3690_v20  ;;  %v1236_v39 = vrot.slane %v1218_v18, %v3666_v63  ;;  %v3090_v46 = vmul.f32 -1.442695, %v3656_v45  ;;  %v1045_v45 = vld [vmem:[#allocation2 + $0x30] sm:$0xf] }
 0x290   : > { %v1501_v37 = vceil.f32 %v1499_v30  ;;  %v3091_v53 = vmul.f32 -1.442695, %v988_v52  ;;  %v1376_v57 = vrot.slane %v3682_v15, 3  ;;  %v1412_v58 = vrot.slane %v3682_v15, 1  ;;  %v1443_v8 = vld [vmem:[#allocation2 + $0x30] sm:$0xf0] }
 0x291   : > { %v1226_v38 = vrot.slane %v1219_v31, %v3666_v63  ;;  %v1502_v49 = vceil.f32 %v1500_v35  ;;  %3212 = vpow2.f32 %v3097_v36  ;;  %v3710_v6 = vsub.f32 %v1208_v27, %v1236_v39 }
 0x292   : > { %v3203_v47 = vpop.eup %3202  ;;  %v1241_v40 = vcombine.high %v1236_v39, %v1236_v39  ;;  %v3092_v13 = vmul.f32 -1.442695, %v1045_v45  ;;  %v998_v18 = vadd.f32 %v997_v24, %v3628_v21  ;;  %v1000_v23 = vadd.f32 %v999_v29, %v3631_v22 }
 0x293   : > { %v3205_v54 = vpop.eup %3204  ;;  %v1266_v55 = vadd.f32 1.0, %v3203_v47  ;;  %v1005_v59 = vpop.f32.mrb[12].mxu1  ;;  %v1227_v61 = vcombine.high %v1226_v38, %v1226_v38  ;;  %v1505_v1 = vcombine.low %v1501_v37, %v1502_v49  ;;  %v1046_v12 = vld [vmem:[#allocation2 + $0x38] sm:$0xf]  ;;  %v1444_v14 = vld [vmem:[#allocation2 + $0x38] sm:$0xf0]  ;;  %v3718_v30 = vadd.f32 %v1226_v38, %v1206_v26 }
 0x294   : > { %v3207_v60 = vpop.eup %3206  ;;  %v1267_v62 = vadd.f32 1.0, %v3205_v54  ;;  %v1007_v2 = vpop.f32.mrb[13].mxu1  ;;  %v3098_v31 = vmul.f32 -1.442695, %v1443_v8  ;;  %v3093_v37 = vmul.f32 -1.442695, %v1046_v12  ;;  %v3722_v39 = vadd.f32 %v1241_v40, %v1208_v27 }
 0x295   : > { %3214 = vrcp.f32 %v1266_v55  ;;  %v1065_v7 = vadd.f32 1.0, %v3207_v60  ;;  %v1009_v9 = vpop.f32.mrb[14].mxu1  ;;  %v1512_v10 = vrot.slane %v1505_v1, %v3666_v63  ;;  %v3716_v28 = vsub.f32 %v1206_v26, %v1227_v61  ;;  %4779 = vst [vmem:[#allocation20_spill] sm:$0xff] %v3718_v30 }
 0x296   : > { %v3209_v4 = vpop.eup %3208  ;;  %3216 = vrcp.f32 %v1267_v62  ;;  %v3099_v21 = vmul.f32 -1.442695, %v1444_v14  ;;  %v3100_v26 = vmul.f32 -1.442695, %v3693_v3  ;;  %v1002_v29 = vadd.f32 %v1001_v32, %v3631_v22  ;;  %v3832_v24 = vpop.f32.mrb[15].mxu1 }
 0x297   : > { %v1268_v11 = vadd.f32 1.0, %v3209_v4  ;;  %3218 = vrcp.f32 %v1065_v7  ;;  %v1513_v47 = vcombine.high %v1512_v10, %v1512_v10  ;;  %v3729_v49 = vrot.slane %v3716_v28, %v3590_v42  ;;  %4792 = vst [vmem:[#allocation33_spill] sm:$0xff] %v3832_v24 }
 0x298   : > { %v3211_v38 = vpop.eup %3210  ;;  %v3733_v27 = vrot.slane %v3718_v30, %v3590_v42  ;;  %v3101_v54 = vmul.f32 -1.442695, %v998_v18  ;;  %v3102_v3 = vmul.f32 -1.442695, %v1000_v23  ;;  %v3742_v32 = vrot.slane %v3722_v39, %v3590_v42 }
 0x299   : > { %3220 = vrcp.f32 %v1268_v11  ;;  %4780 = vst [vmem:[#allocation21_spill] sm:$0xff] %v3729_v49  ;;  %v1520_v22 = vrot.slane %v1513_v47, %v3666_v63  ;;  %v1006_v60 = vadd.f32 %v1005_v59, %v3622_v17  ;;  %v1008_v1 = vadd.f32 %v1007_v2, %v3622_v17 }
 0x29a   : > { %3222 = vpow2.f32 %v3090_v46  ;;  %4781 = vst [vmem:[#allocation22_spill] sm:$0xff] %v3733_v27  ;;  %v3737_v46 = vrot.slane %v3710_v6, %v3590_v42  ;;  %4783 = vst [vmem:[#allocation24_spill] sm:$0xff] %v3742_v32  ;;  %v1010_v45 = vadd.f32 %v1009_v9, %v3624_v19  ;;  %v3751_v7 = vrot.slane %v3662_v51, %v3590_v42 }
 0x29b   : > { %3224 = vpow2.f32 %v3091_v53  ;;  %v1066_v53 = vadd.f32 1.0, %v3211_v38  ;;  %v3213_v55 = vpop.eup %3212  ;;  %1026 = vst [vmem:[#allocation2 + $0x60] sm:$0xff] %v1006_v60  ;;  %v1292_v8 = vadd.f32 %v3718_v30, %v3716_v28  ;;  %v1294_v59 = vadd.f32 %v3722_v39, %v3710_v6  ;;  %1027 = vst [vmem:[#allocation2 + $0x68] sm:$0xff] %v1008_v1 }
 0x29c   : > { %3226 = vpow2.f32 %v3092_v13  ;;  %4782 = vst [vmem:[#allocation23_spill] sm:$0xff] %v3737_v46  ;;  %v1269_v62 = vadd.f32 1.0, %v3213_v55  ;;  %4784 = vst [vmem:[#allocation25_spill] sm:$0xff] %v3751_v7  ;;  %v3761_v17 = vrot.slane %v3659_v50, %v3590_v42  ;;  %v3103_v2 = vmul.f32 -1.442695, %v1002_v29 }
 0x29d   : > { %3228 = vpow2.f32 %v3098_v31  ;;  %v3765_v9 = vrot.slane %v3716_v28, %v3593_v43  ;;  %1028 = vst [vmem:[#allocation2 + $0x70] sm:$0xff] %v1010_v45  ;;  %v3768_v11 = vadd.f32 %v1520_v22, %v3716_v28  ;;  %v3771_v12 = vsub.f32 %v3718_v30, %v1520_v22 }
 0x29e   : > { %3230 = vpow2.f32 %v3093_v37  ;;  %4785 = vst [vmem:[#allocation26_spill] sm:$0xff] %v3761_v17  ;;  %v3775_v13 = vrot.slane %v3718_v30, %v3593_v43  ;;  %v3382_v37 = vmov 1.0   ;;  %v3782_v29 = vmul.f32 0.5, %v1294_v59 }
 0x29f   : > { %3232 = vpow2.f32 %v3099_v21  ;;  %v3215_v61 = vpop.eup %3214  ;;  %4786 = vst [vmem:[#allocation27_spill] sm:$0xff] %v3765_v9  ;;  %v3796_v22 = vrot.slane %v3722_v39, %v3593_v43  ;;  %v3802_v1 = vrot.slane %v3662_v51, %v3593_v43  ;;  %v3806_v45 = vrot.slane %v3659_v50, %v3593_v43 }
 0x2a0   : > { %3234 = vrcp.f32 %v1066_v53  ;;  %v3747_v4 = vpop.eup %3216  ;;  %4787 = vst [vmem:[#allocation28_spill] sm:$0xff] %v3775_v13 }
 0x2a1   : > { %3236 = vpow2.f32 %v3100_v26  ;;  %v3757_v40 = vpop.eup %3218  ;;  %v3780_v26 = vmul.f32 0.5, %v1292_v8  ;;  %4789 = vst [vmem:[#allocation30_spill] sm:$0xff] %v3796_v22  ;;  %4790 = vst [vmem:[#allocation31_spill] sm:$0xff] %v3802_v1 }
 0x2a2   : > { %3238 = vrcp.f32 %v1269_v62  ;;  %4791 = vst [vmem:[#allocation32_spill] sm:$0xff] %v3806_v45  ;;  %v3808_v8 = vld [vmem:[#allocation2 + $0x60] sm:$0xfc]  ;;  %v1449_v59 = vld [vmem:[#allocation2 + $0x60] sm:$0x3] }
 0x2a3   : > { %v3221_v10 = vpop.eup %3220  ;;  %3240 = vpow2.f32 %v3101_v54 }
 0x2a4   : > { %v3223_v14 = vpop.eup %3222  ;;  %vm1278_vm11 = vcmp.gt.f32.partialorder %v3221_v10, 0.9  ;;  %v1334_v18 = vrot.slane %v3221_v10, 4  ;;  %v1347_v23 = vsel %vm640_vm0, %v3221_v10, %v1328_v33  ;;  %3242 = vpow2.f32 %v3102_v3 }
 0x2a5   : > { %v3225_v31 = vpop.eup %3224  ;;  %v1280_v47 = vsel %vm1278_vm11, 0.0, %v3382_v37  ;;  %v1067_v21 = vadd.f32 1.0, %v3223_v14  ;;  %3244 = vpow2.f32 %v3103_v2  ;;  %v3792_v3 = vrot.slane %v3710_v6, %v3593_v43 }
 0x2a6   : > { %v3227_v38 = vpop.eup %3226  ;;  %v1285_v53 = vrot.slane %v1280_v47, %v3590_v42  ;;  %v1068_v54 = vadd.f32 1.0, %v3225_v31  ;;  %v1349_v55 = vsel %vm1104_vm8, %v1347_v23, %v1334_v18  ;;  %v1088_v10 = vrot.slane %v3757_v40, 2  ;;  %v1450_v31 = vld [vmem:[#allocation2 + $0x68] sm:$0x3]  ;;  %v3813_v47 = vld [vmem:[#allocation2 + $0x70] sm:$0x3] }
 0x2a7   : > { %v3229_v0 = vpop.eup %3228  ;;  %3246 = vrcp.f32 %v1067_v21  ;;  %v1069_v33 = vadd.f32 1.0, %v3227_v38  ;;  %1353 = vst [vmem:[%s3787_s25 + $0x10] sm:$0x3f] %v1349_v55  ;;  %4788 = vst [vmem:[#allocation29_spill] sm:$0xff] %v3792_v3  ;;  %v1300_v21 = vrot.slane %v3780_v26, %v3590_v42  ;;  %v1304_v38 = vrot.slane %v3780_v26, %v3593_v43 }
 0x2a8   : > { %v3231_v60 = vpop.eup %3230  ;;  %v3798_v62 = vmul.f32 %v3215_v61, %v1285_v53  ;;  %3248 = vrcp.f32 %v1068_v54  ;;  %v3104_v61 = vmul.f32 -1.442695, %v1449_v59  ;;  %v1475_v23 = vadd.f32 1.0, %v3229_v0 }
 0x2a9   : > { %v3233_v2 = vpop.eup %3232  ;;  %3250 = vrcp.f32 %v1069_v33  ;;  %v1070_v14 = vadd.f32 1.0, %v3231_v60  ;;  %v1311_v53 = vrot.slane %v3782_v29, %v3590_v42  ;;  %v1124_v55 = vsel %vm4757_vm9, %v3808_v8, -inf }
 0x2aa   : > { %v3811_v18 = vpop.eup %3234  ;;  %v3824_v54 = vmul.f32 %v4735_v56, %v3798_v62  ;;  %v1315_v0 = vrot.slane %v3782_v29, %v3593_v43  ;;  %v1476_v60 = vadd.f32 1.0, %v3233_v2  ;;  %v3105_v26 = vmul.f32 -1.442695, %v1450_v31 }
 0x2ab   : > { %v3237_v40 = vpop.eup %3236  ;;  %3252 = vrcp.f32 %v1070_v14  ;;  %v1126_v52 = vsel %vm1125_vm10, %v3813_v47, -inf  ;;  %v1380_v2 = vmul.f32 %v1376_v57, %v3798_v62  ;;  %v1416_v35 = vmul.f32 %v1412_v58, %v3798_v62 }
 0x2ac   : > { %v3239_v33 = vpop.eup %3238  ;;  %v1477_v59 = vadd.f32 1.0, %v3237_v40  ;;  %3254 = vpow2.f32 %v3104_v61  ;;  %v1127_v40 = vmax.f32 %v1124_v55, %v1126_v52  ;;  %v1091_v61 = vrot.slane %v3811_v18, 2 }
 0x2ad   : > { %v3241_v36 = vpop.eup %3240  ;;  %vm1279_vm13 = vcmp.gt.f32.partialorder %v3239_v33, 0.9  ;;  %v1335_v56 = vrot.slane %v3239_v33, 4  ;;  %v1348_v14 = vsel %vm640_vm0, %v3239_v33, %v1329_v34  ;;  %3256 = vrcp.f32 %v1475_v23 }
 0x2ae   : > { %v3243_v29 = vpop.eup %3242  ;;  %v1281_v31 = vsel %vm1279_vm13, 0.0, %v3382_v37  ;;  %3258 = vpow2.f32 %v3105_v26  ;;  %v1128_v33 = vrot.slane %v1127_v40, 4  ;;  %v1338_v57 = vsel %vm640_vm0, %v1300_v21, %v1311_v53 }
 0x2af   : > { %v1289_v48 = vrot.slane %v1281_v31, %v3590_v42  ;;  %v1350_v5 = vsel %vm1104_vm8, %v1348_v14, %v1335_v56  ;;  %v3245_v34 = vpop.eup %3244  ;;  %3260 = vrcp.f32 %v1476_v60  ;;  %v1478_v58 = vadd.f32 1.0, %v3241_v36 }
 0x2b0   : > { %1354 = vst [vmem:[%s3787_s25 + $0x18] sm:$0x3f] %v1350_v5  ;;  %3262 = vrcp.f32 %v1477_v59  ;;  %v1479_v23 = vadd.f32 1.0, %v3243_v29  ;;  %v1129_v56 = vmax.f32 %v1127_v40, %v1128_v33  ;;  %v1339_v26 = vsel %vm640_vm0, %v1304_v38, %v1315_v0 }
 0x2b1   : > { %v3247_v37 = vpop.eup %3246  ;;  %v3849_v52 = vmul.f32 %v3747_v4, %v1289_v48  ;;  %v4793_v18 = vrot.slane %v3682_v15, 7  ;;  %v4794_v21 = vrot.slane %v3690_v20, 5  ;;  %v4795_v48 = vrot.slane %v3690_v20, 3 }
 0x2b2   : > { %v3249_v55 = vpop.eup %3248  ;;  %v1089_v31 = vrot.slane %v3247_v37, 2  ;;  %v4796_v36 = vrot.slane %v3690_v20, 1  ;;  %v1105_v0 = vrot.slane %v3247_v37, 3  ;;  %v1130_v5 = vrot.slane %v1129_v56, 2 }
 0x2b3   : > { %v1340_v60 = vsel %vm1125_vm10, %v1338_v57, %v4793_v18  ;;  %v3251_v14 = vpop.eup %3250  ;;  %v1356_v53 = vmul.f32 %v4794_v21, %v3849_v52  ;;  %v1381_v4 = vmul.f32 %v4795_v48, %v3849_v52  ;;  %v1092_v29 = vrot.slane %v3249_v55, 2 }
 0x2b4   : > { %v1417_v59 = vmul.f32 %v4796_v36, %v3849_v52  ;;  %v1090_v38 = vsel %vm1087_vm12, %v1088_v10, %v1089_v31  ;;  %1100 = vst [vmem:[%s3866_s0 + $0x10] sm:$0x1] %v1089_v31  ;;  %v1106_v40 = vrot.slane %v3251_v14, 3  ;;  %v1108_v10 = vrot.slane %v3249_v55, 3 }
 0x2b5   : > { %v3253_v33 = vpop.eup %3252  ;;  %v1359_v57 = vcombine.high %v3824_v54, %v1356_v53  ;;  %v1384_v18 = vcombine.high %v1380_v2, %v1381_v4  ;;  %1098 = vst [vmem:[%s3866_s0] sm:$0xff] %v1090_v38  ;;  %v1093_v48 = vsel %vm1087_vm12, %v1091_v61, %v1092_v29  ;;  %1101 = vst [vmem:[%s3866_s0 + $0x18] sm:$0x1] %v1092_v29  ;;  %v4797_v61 = vrot.slane %v3690_v20, 7 }
 0x2b6   : > { %v1420_v21 = vcombine.high %v1416_v35, %v1417_v59  ;;  %1099 = vst [vmem:[%s3866_s0 + $0x8] sm:$0xff] %v1093_v48  ;;  %v1107_v36 = vsel %vm1104_vm8, %v1105_v0, %v1106_v40  ;;  %1117 = vst [vmem:[%s3876_s26 + $0x10] sm:$0x1] %v1106_v40  ;;  %v1109_v37 = vrot.slane %v3253_v33, 3  ;;  %v1131_v31 = vmax.f32 %v1129_v56, %v1130_v5  ;;  %v3255_v14 = vpop.eup %3254 }
 0x2b7   : > { %v1366_v35 = vrot.slane %v1359_v57, %v3666_v63  ;;  %v1391_v54 = vrot.slane %v1384_v18, %v3666_v63  ;;  %1115 = vst [vmem:[%s3876_s26] sm:$0xff] %v1107_v36  ;;  %v1341_v55 = vsel %vm1125_vm10, %v1339_v26, %v4797_v61  ;;  %v3886_v53 = vpop.eup %3256  ;;  %3264 = vrcp.f32 %v1478_v58 }
 0x2b8   : > { %v1427_v2 = vrot.slane %v1420_v21, %v3666_v63  ;;  %v1110_v4 = vsel %vm1104_vm8, %v1108_v10, %v1109_v37  ;;  %1118 = vst [vmem:[%s3876_s26 + $0x18] sm:$0x1] %v1109_v37  ;;  %v1132_v56 = vrot.slane %v1131_v31, 1  ;;  %v4798_v59 = vrot.slane %v3682_v15, 5  ;;  %v3259_v38 = vpop.eup %3258 }
 0x2b9   : > { %v1373_v0 = vrot.slane %v1366_v35, %v3666_v63  ;;  %v1398_v40 = vrot.slane %v1391_v54, %v3666_v63  ;;  %v1402_v5 = vcombine.high %v1391_v54, %v1391_v54  ;;  %1116 = vst [vmem:[%s3876_s26 + $0x8] sm:$0xff] %v1110_v4  ;;  %v3896_v33 = vpop.eup %3260  ;;  %v1480_v57 = vadd.f32 1.0, %v3245_v34 }
 0x2ba   : > { %v1343_v29 = vsel %vm1342_vm14, %v1340_v60, %v4798_v59  ;;  %v1428_v26 = vcombine.high %v1427_v2, %v1427_v2  ;;  %v1481_v18 = vadd.f32 1.0, %v3255_v14  ;;  %v4799_v58 = vrot.slane %v3690_v20, 5  ;;  %v3903_v60 = vpop.eup %3262 }
 0x2bb   : > { %v1345_v15 = vsel %vm934_vm6, %v1343_v29, %v3798_v62  ;;  %v3906_v48 = vadd.f32 %v1373_v0, %v3716_v28  ;;  %v1399_v10 = vcombine.high %v1398_v40, %v1398_v40  ;;  %v1409_v36 = vrot.slane %v1402_v5, %v3666_v63 }
 0x2bc   : > { %v1344_v21 = vsel %vm1342_vm14, %v1341_v55, %v4799_v58  ;;  %v1435_v37 = vrot.slane %v1428_v26, %v3666_v63  ;;  %1351 = vst [vmem:[%s3787_s25] sm:$0xff] %v1345_v15  ;;  %3266 = vrcp.f32 %v1479_v23  ;;  %v1482_v34 = vadd.f32 1.0, %v3259_v38 }
 0x2bd   : > { %v3911_v20 = vmax.f32 %v1131_v31, %v1132_v56  ;;  %v1346_v14 = vsel %vm934_vm6, %v1344_v21, %v3849_v52  ;;  %v3916_v62 = vsub.f32 %v3718_v30, %v1399_v10  ;;  %v3919_v35 = vadd.f32 %v1409_v36, %v3710_v6 }
 0x2be   : > { %v1436_v54 = vcombine.high %v1435_v37, %v1435_v37  ;;  %v1591_v2 = vsub.f32 %v3716_v28, %v3906_v48  ;;  %1352 = vst [vmem:[%s3787_s25 + $0x8] sm:$0xff] %v1346_v14  ;;  %v3926_v23 = vsub.f32 %v3718_v30, %v3906_v48  ;;  %3268 = vrcp.f32 %v1480_v57 }
 0x2bf   : > { %4800 = vst [vmem:[#allocation34_spill] sm:$0xff] %v3919_v35  ;;  %v1842_v31 = vmul.f32 0.125, %v3710_v6  ;;  %v3930_v52 = vmul.f32 0.125, %v3716_v28  ;;  %v3937_v55 = vsub.f32 %v3919_v35, %v3710_v6  ;;  %v1678_v4 = vsub.f32 %v3916_v62, %v3716_v28 }
 0x2c0   : > { %v3933_v61 = vsub.f32 %v3722_v39, %v1436_v54  ;;  %3270 = vrcp.f32 %v1481_v18  ;;  %v1670_v56 = vadd.f32 1e-08, %v3926_v23  ;;  %v1757_v59 = vsub.f32 %v3718_v30, %v3916_v62 }
 0x2c1   : > { %4801 = vst [vmem:[#allocation35_spill] sm:$0xff] %v3930_v52  ;;  %3272 = vrcp.f32 %v1482_v34  ;;  %v3945_v29 = vmul.f32 0.125, %v3718_v30  ;;  %v1592_v38 = vadd.f32 1e-08, %v1591_v2  ;;  %v1641_v0 = vrot.slane %v3937_v55, %v3590_v42  ;;  %v3953_v26 = vpop.eup %3264 }
 0x2c2   : > { %v1793_v40 = vsub.f32 %v3722_v39, %v3919_v35  ;;  %v1143_v5 = vsub.f32 %v3808_v8, %v3911_v20  ;;  %v1645_v57 = vrot.slane %v3937_v55, %v3593_v43  ;;  %3274 = vrcp.f32 %v1670_v56 }
 0x2c3   : > { %4802 = vst [vmem:[#allocation36_spill] sm:$0xff] %v3945_v29  ;;  %v1683_v18 = vrot.slane %v1678_v4, %v3590_v42  ;;  %v1687_v58 = vrot.slane %v1678_v4, %v3593_v43  ;;  %v3961_v21 = vsub.f32 %v3933_v61, %v3710_v6  ;;  %v3964_v15 = vmul.f32 %v3886_v53, %v1641_v0 }
 0x2c4   : > { %v3968_v8 = vsub.f32 %v3722_v39, %v3933_v61  ;;  %v1762_v10 = vrot.slane %v1757_v59, %v3590_v42  ;;  %v3972_v36 = vmul.f32 %v3896_v33, %v1645_v57  ;;  %v1766_v14 = vrot.slane %v1757_v59, %v3593_v43 }
 0x2c5   : > { %v3975_v37 = vmul.f32 %v3886_v53, %v1683_v18  ;;  %v3978_v34 = vmul.f32 %v3896_v33, %v1687_v58  ;;  %v1798_v24 = vrot.slane %v1793_v40, %v3590_v42  ;;  %v1441_v18 = vadd.f32 %v3933_v61, %v3919_v35 }
 0x2c6   : > { %v1718_v54 = vrot.slane %v3968_v8, %v3590_v42  ;;  %v1722_v56 = vrot.slane %v3968_v8, %v3593_v43  ;;  %v1769_v0 = vmul.f32 %v3886_v53, %v1762_v10  ;;  %v3987_v57 = vpop.eup %3266  ;;  %v1770_v58 = vmul.f32 %v3896_v33, %v1766_v14 }
 0x2c7   : > { %v1802_v19 = vrot.slane %v1793_v40, %v3593_v43  ;;  %v1829_v29 = vadd.f32 1e-08, %v1757_v59  ;;  %v1805_v44 = vmul.f32 %v3886_v53, %v1798_v24  ;;  %v2115_v45 = vmul.f32 %v1591_v2, %v1591_v2 }
 0x2c8   : > { %v1725_v25 = vmul.f32 %v3886_v53, %v1718_v54  ;;  %v1726_v16 = vmul.f32 %v3896_v33, %v1722_v56  ;;  %v3996_v10 = vpop.eup %3268  ;;  %v1773_v17 = vcombine.high %v1769_v0, %v1770_v58  ;;  %v2116_v1 = vmul.f32 %v3961_v21, %v3961_v21 }
 0x2c9   : > { %v1806_v41 = vmul.f32 %v3896_v33, %v1802_v19  ;;  %3276 = vrcp.f32 %v1829_v29  ;;  %v2125_v59 = vsub.f32 %v3916_v62, %v3718_v30  ;;  %v2127_v54 = vmul.f32 %v1793_v40, %v1793_v40 }
 0x2ca   : > { %v4001_v14 = vpop.eup %3270  ;;  %v1729_v7 = vcombine.high %v1725_v25, %v1726_v16  ;;  %v2138_v56 = vadd.f32 0.0001, %v3926_v23  ;;  %v1780_v2 = vrot.slane %v1773_v17, %v3666_v63  ;;  %v4009_v58 = vadd.f32 %v2116_v1, %v2115_v45 }
 0x2cb   : > { %v4006_v24 = vpop.eup %3272  ;;  %v1809_v0 = vcombine.high %v1805_v44, %v1806_v41  ;;  %v2141_v19 = vadd.f32 0.0001, %v1678_v4  ;;  %v2126_v29 = vmul.f32 %v2125_v59, %v2125_v59  ;;  %v1145_v13 = vsub.f32 %v3813_v47, %v3911_v20 }
 0x2cc   : > { %3278 = vrcp.f32 %v2138_v56  ;;  %v4013_v16 = vadd.f32 1.0, %v1842_v31  ;;  %v3275_v25 = vpop.eup %3274  ;;  %v1781_v27 = vcombine.high %v1780_v2, %v1780_v2  ;;  %v2091_v17 = vsub.f32 %v3906_v48, %v3718_v30 }
 0x2cd   : > { %v1816_v40 = vrot.slane %v1809_v0, %v3666_v63  ;;  %3280 = vrsqrt.f32 %v4009_v58  ;;  %v4019_v41 = vmul.f32 0.5, %v1441_v18  ;;  %v4022_v44 = vmul.f32 %v3275_v25, %v3937_v55 }
 0x2ce   : > { %3282 = vrcp.f32 %v1592_v38  ;;  %v4024_v1 = vadd.f32 %v2127_v54, %v2126_v29  ;;  %v1788_v45 = vrot.slane %v1781_v27, %v3666_v63  ;;  %v1147_v20 = vmul.f32 1.442695, %v1143_v5 }
 0x2cf   : > { %4803 = vst [vmem:[#allocation37_spill] sm:$0xff] %v4022_v44  ;;  %v1817_v47 = vcombine.high %v1816_v40, %v1816_v40  ;;  %3284 = vrcp.f32 %v2141_v19  ;;  %vm1756_vm15 = vcmp.gt.f32.partialorder %v3916_v62, %v3771_v12  ;;  %v1828_v31 = vsub.f32 %v3919_v35, %v3722_v39 }
 0x2d0   : > { %3286 = vrsqrt.f32 %v4024_v1  ;;  %v1151_v4 = vmul.f32 1.442695, %v1145_v13  ;;  %v4033_v38 = vrot.slane %v1729_v7, %v3666_v63  ;;  %v1789_v18 = vcombine.high %v1788_v45, %v1788_v45 }
 0x2d1   : > { %v1824_v59 = vrot.slane %v1817_v47, %v3666_v63  ;;  %v4038_v27 = vsub.f32 %v3933_v61, %v3722_v39  ;;  %vm2120_vm1 = vcmp.eq.f32.partialorder %v4009_v58, inf  ;;  %v4043_v5 = vrot.slane %v4019_v41, %v3590_v42 }
 0x2d2   : > { %v1748_v54 = vsub.f32 %v3716_v28, %v3916_v62  ;;  %v2093_v7 = vsub.f32 %v3710_v6, %v3919_v35  ;;  %v1791_v56 = vsub.f32 %v3718_v30, %v1789_v18  ;;  %vm2122_vm2 = vcmp.eq.f32.partialorder %v4009_v58, 0.0 }
 0x2d3   : > { %v3277_v13 = vpop.eup %3276  ;;  %v1439_v2 = vadd.f32 %v3916_v62, %v3906_v48  ;;  %v2104_v0 = vmul.f32 %v4038_v27, %v4038_v27  ;;  %3288 = vpow2.f32 %v1147_v20  ;;  %v2123_v19 = vand.u32 2147483648, %v4009_v58 }
 0x2d4   : > { %v4058_v29 = vrot.slane %v4019_v41, %v3593_v43  ;;  %v2092_v25 = vmul.f32 %v2091_v17, %v2091_v17  ;;  %v2094_v40 = vmul.f32 %v2093_v7, %v2093_v7  ;;  %v1792_v45 = vsel %vm1756_vm15, %v3916_v62, %v1791_v56 }
 0x2d5   : > { %v1825_v47 = vcombine.high %v1824_v59, %v1824_v59  ;;  %v1831_v18 = vmul.f32 %v3277_v13, %v1828_v31  ;;  %v2103_v35 = vmul.f32 %v1748_v54, %v1748_v54  ;;  %v1832_v22 = vsub.f32 %v1792_v45, %v3916_v62 }
 0x2d6   : > { %v3279_v44 = vpop.eup %3278  ;;  %v1877_v20 = vmul.f32 0.125, %v1792_v45  ;;  %v1749_v9 = vadd.f32 1e-08, %v1748_v54  ;;  %v4065_v32 = vadd.f32 %v2094_v40, %v2092_v25  ;;  %v4068_v17 = vmul.f32 0.5, %v1439_v2 }
 0x2d7   : > { %v3281_v49 = vpop.eup %3280  ;;  %v2140_v3 = vmul.f32 %v3279_v44, %v3937_v55  ;;  %v4070_v7 = vadd.f32 %v2104_v0, %v2103_v35  ;;  %3290 = vpow2.f32 %v1151_v4  ;;  %v1833_v59 = vmul.f32 %v1832_v22, %v1831_v18 }
 0x2d8   : > { %v4072_v46 = vpop.eup %3282  ;;  %v3111_v31 = vadd.f32 -1.0, %v1877_v20  ;;  %v2119_v13 = vmul.f32 %v3281_v49, %v4009_v58  ;;  %3292 = vrsqrt.f32 %v4065_v32  ;;  %v1827_v54 = vsub.f32 %v3722_v39, %v1825_v47 }
 0x2d9   : > { %v3285_v56 = vpop.eup %3284  ;;  %vm2131_vm3 = vcmp.eq.f32.partialorder %v4024_v1, inf  ;;  %vm2133_vm4 = vcmp.eq.f32.partialorder %v4024_v1, 0.0  ;;  %v2134_v55 = vand.u32 2147483648, %v4024_v1  ;;  %v1834_v44 = vadd.f32 %v1833_v59, %v3722_v39 }
 0x2da   : > { %v3287_v35 = vpop.eup %3286  ;;  %v2121_v22 = vsel %vm2120_vm1, %v4009_v58, %v2119_v13  ;;  %v2143_v49 = vmul.f32 %v3285_v56, %v3968_v8  ;;  %3294 = vrcp.f32 %v1749_v9  ;;  %v2146_v2 = vmul.f32 %v2140_v3, %v2140_v3 }
 0x2db   : > { %v2130_v4 = vmul.f32 %v3287_v35, %v4024_v1  ;;  %3296 = vrsqrt.f32 %v4070_v7  ;;  %v4089_v0 = vrot.slane %v4068_v17, %v3590_v42  ;;  %v1835_v25 = vsel %vm1756_vm15, %v1827_v54, %v1834_v44 }
 0x2dc   : > { %v1879_v40 = vsub.f32 %v3111_v31, %v3659_v50  ;;  %v2124_v8 = vsel %vm2122_vm2, %v2123_v19, %v2121_v22  ;;  %v4099_v9 = vrot.slane %v4068_v17, %v3593_v43  ;;  %v1874_v47 = vmul.f32 0.125, %v1835_v25 }
 0x2dd   : > { %v4101_v45 = vpop.eup %3288  ;;  %v2132_v18 = vsel %vm2131_vm3, %v4024_v1, %v2130_v4  ;;  %v4106_v20 = vmul.f32 %v2143_v49, %v2140_v3  ;;  %v2148_v59 = vmul.f32 %v2143_v49, %v2143_v49  ;;  %v2163_v31 = vadd.f32 %v2143_v49, %v2140_v3 }
 0x2de   : > { %v2135_v50 = vsel %vm2133_vm4, %v2134_v55, %v2132_v18  ;;  %vm2098_vm5 = vcmp.eq.f32.partialorder %v4065_v32, inf  ;;  %v2101_v58 = vand.u32 2147483648, %v4065_v32  ;;  %v3110_v19 = vadd.f32 -1.0, %v1874_v47 }
 0x2df   : > { %v2136_v13 = vadd.f32 %v2135_v50, %v2124_v8  ;;  %v2147_v56 = vadd.f32 1.0, %v2146_v2  ;;  %v2149_v54 = vadd.f32 1.0, %v2148_v59  ;;  %v2076_v35 = vrot.slane %v1879_v40, %v3590_v42 }
 0x2e0   : > { %v2080_v44 = vrot.slane %v1879_v40, %v3593_v43  ;;  %vm2100_vm7 = vcmp.eq.f32.partialorder %v4065_v32, 0.0  ;;  %v1159_v1 = vrot.slane %v4101_v45, 2  ;;  %v1524_v3 = vsub.f32 %v3906_v48, %v3716_v28 }
 0x2e1   : > { %v4121_v55 = vpop.eup %3290  ;;  %v1876_v22 = vsub.f32 %v3110_v19, %v3662_v51  ;;  %v2137_v49 = vmul.f32 0.5, %v2136_v13  ;;  %v2145_v4 = vsub.f32 1.0, %v4106_v20  ;;  %v2150_v2 = vmul.f32 %v2149_v54, %v2147_v56 }
 0x2e2   : > { %v3293_v25 = vpop.eup %3292  ;;  %vm2164_vm11 = vcmp.ge.f32.partialorder %v2163_v31, 0.0  ;;  %vm2108_vm13 = vcmp.eq.f32.partialorder %v4070_v7, inf  ;;  %vm2110_vm15 = vcmp.eq.f32.partialorder %v4070_v7, 0.0  ;;  %v1160_v40 = vrot.slane %v4121_v55, 2 }
 0x2e3   : > { %v2065_v8 = vrot.slane %v1876_v22, %v3590_v42  ;;  %v2069_v47 = vrot.slane %v1876_v22, %v3593_v43  ;;  %3298 = vrsqrt.f32 %v2150_v2  ;;  %v2209_v18 = vmul.f32 0.5, %v2137_v49 }
 0x2e4   : > { %v3295_v51 = vpop.eup %3294  ;;  %v2215_v59 = vrot.slane %v2137_v49, %v3590_v42  ;;  %v2097_v20 = vmul.f32 %v3293_v25, %v4065_v32  ;;  %v1161_v50 = vsel %vm1087_vm12, %v1159_v1, %v1160_v40  ;;  %v1529_v19 = vrot.slane %v1524_v3, %v3590_v42 }
 0x2e5   : > { %v3297_v13 = vpop.eup %3296  ;;  %v2083_v56 = vsel %vm640_vm0, %v2065_v8, %v2076_v35  ;;  %v2084_v54 = vsel %vm640_vm0, %v2069_v47, %v2080_v44  ;;  %v2210_v52 = vsub.f32 %v4019_v41, %v2209_v18  ;;  %v1167_v30 = vrot.slane %v1161_v50, 4 }
 0x2e6   : > { %2089 = vst [vmem:[%s4138_s23 + $0x20] sm:$0x3] %v2083_v56  ;;  %2090 = vst [vmem:[%s4138_s23 + $0x28] sm:$0x3] %v2084_v54  ;;  %v2219_v22 = vrot.slane %v2137_v49, %v3593_v43  ;;  %v2099_v1 = vsel %vm2098_vm5, %v4065_v32, %v2097_v20  ;;  %v2107_v2 = vmul.f32 %v3297_v13, %v4070_v7  ;;  %v3383_v44 = vmov -1.0  }
 0x2e7   : > { %v1533_v35 = vrot.slane %v1524_v3, %v3593_v43  ;;  %v4149_v41 = vsel %vm2164_vm11, 1.0, %v3383_v44  ;;  %v2230_v25 = vrot.slane %v2210_v52, %v3590_v42  ;;  %v4153_v40 = vmul.f32 %v3295_v51, %v4038_v27 }
 0x2e8   : > { %v2111_v8 = vand.u32 2147483648, %v4070_v7  ;;  %v2234_v49 = vrot.slane %v2210_v52, %v3593_v43  ;;  %v2109_v47 = vsel %vm2108_vm13, %v4070_v7, %v2107_v2  ;;  %v1168_v18 = vadd.f32 %v1167_v30, %v1161_v50 }
 0x2e9   : > { %v1536_v3 = vmul.f32 %v3886_v53, %v1529_v19  ;;  %v2222_v31 = vmul.f32 %v3903_v60, %v2215_v59  ;;  %v2102_v20 = vsel %vm2100_vm7, %v2101_v58, %v2099_v1  ;;  %v1563_v51 = vrot.slane %v3961_v21, %v3590_v42 }
 0x2ea   : > { %v2112_v27 = vsel %vm2110_vm15, %v2111_v8, %v2109_v47  ;;  %v2223_v52 = vmul.f32 %v3953_v26, %v2219_v22  ;;  %v1169_v56 = vrot.slane %v1168_v18, 2  ;;  %v1537_v54 = vmul.f32 %v3896_v33, %v1533_v35 }
 0x2eb   : > { %v2113_v13 = vadd.f32 %v2112_v27, %v2102_v20  ;;  %v2237_v30 = vadd.f32 %v2230_v25, %v2222_v31  ;;  %v2224_v50 = vmul.f32 %v3987_v57, %v2215_v59  ;;  %v2225_v60 = vmul.f32 %v3996_v10, %v2219_v22 }
 0x2ec   : > { %v1567_v32 = vrot.slane %v3961_v21, %v3593_v43  ;;  %v2238_v58 = vadd.f32 %v2234_v49, %v2223_v52  ;;  %v1170_v19 = vadd.f32 %v1169_v56, %v1168_v18  ;;  %v1540_v1 = vcombine.high %v1536_v3, %v1537_v54 }
 0x2ed   : > { %v2114_v7 = vmul.f32 0.5, %v2113_v13  ;;  %v3299_v2 = vpop.eup %3298  ;;  %v2239_v44 = vadd.f32 %v2230_v25, %v2224_v50  ;;  %v2240_v8 = vadd.f32 %v2234_v49, %v2225_v60  ;;  %v1570_v26 = vmul.f32 %v3886_v53, %v1563_v51 }
 0x2ee   : > { %v1571_v47 = vmul.f32 %v3896_v33, %v1567_v32  ;;  %v2152_v35 = vmul.f32 %v3299_v2, %v2145_v4  ;;  %v4179_v20 = vsub.f32 %v2237_v30, %v4043_v5  ;;  %v1171_v27 = vrot.slane %v1170_v19, 1 }
 0x2ef   : > { %v2177_v31 = vmul.f32 0.5, %v2114_v7  ;;  %v2183_v59 = vrot.slane %v2114_v7, %v3590_v42  ;;  %v2187_v22 = vrot.slane %v2114_v7, %v3593_v43  ;;  %v1547_v18 = vrot.slane %v1540_v1, %v3666_v63 }
 0x2f0   : > { %v1574_v3 = vcombine.high %v1570_v26, %v1571_v47  ;;  %v2153_v52 = vadd.f32 1.0, %v2152_v35  ;;  %v2166_v25 = vsub.f32 1.0, %v2152_v35  ;;  %vm1523_vm1 = vcmp.lt.f32.partialorder %v3906_v48, %v3768_v11 }
 0x2f1   : > { %v2178_v49 = vsub.f32 %v4068_v17, %v2177_v31  ;;  %v1606_v4 = vrot.slane %v3926_v23, %v3590_v42  ;;  %v2190_v51 = vmul.f32 %v3987_v57, %v2183_v59  ;;  %v2191_v13 = vmul.f32 %v3996_v10, %v2187_v22 }
 0x2f2   : > { %v2192_v56 = vmul.f32 %v4001_v14, %v2183_v59  ;;  %v1172_v54 = vadd.f32 %v1171_v27, %v1170_v19  ;;  %v2154_v30 = vmul.f32 0.5, %v2153_v52  ;;  %v2167_v50 = vmul.f32 0.5, %v2166_v25 }
 0x2f3   : > { %v2198_v60 = vrot.slane %v2178_v49, %v3590_v42  ;;  %v2202_v32 = vrot.slane %v2178_v49, %v3593_v43  ;;  %v2193_v17 = vmul.f32 %v4006_v24, %v2187_v22  ;;  %v1554_v7 = vrot.slane %v1547_v18, %v3666_v63 }
 0x2f4   : > { %3300 = vrcp.f32 %v1172_v54  ;;  %v1581_v1 = vrot.slane %v1574_v3, %v3666_v63  ;;  %v4195_v2 = vmax.f32 %v2154_v30, 0.0  ;;  %v4197_v57 = vmax.f32 %v2167_v50, 0.0 }
 0x2f5   : > { %v2205_v10 = vadd.f32 %v2198_v60, %v2190_v51  ;;  %v2206_v14 = vadd.f32 %v2202_v32, %v2191_v13  ;;  %v2207_v19 = vadd.f32 %v2198_v60, %v2192_v56  ;;  %v2208_v26 = vadd.f32 %v2202_v32, %v2193_v17  ;;  %v4248_v56 = vld [vmem:[%s3649_s17 + $0x1] ss:$2 sm:$0x3] }
 0x2f6   : > { %v1556_v47 = vadd.f32 %v1554_v7, %v3716_v28  ;;  %v1610_v35 = vrot.slane %v3926_v23, %v3593_v43  ;;  %3302 = vrsqrt.f32 %v4195_v2  ;;  %v4204_v24 = vsub.f32 %v2238_v58, %v4058_v29 }
 0x2f7   : > { %v4207_v31 = vsub.f32 %v2239_v44, %v4043_v5  ;;  %v1588_v59 = vrot.slane %v1581_v1, %v3666_v63  ;;  %v2161_v22 = vand.u32 2147483648, %v4195_v2  ;;  %3304 = vrsqrt.f32 %v4197_v57 }
 0x2f8   : > { %v4213_v27 = vsub.f32 %v2240_v8, %v4058_v29  ;;  %v1594_v23 = vmul.f32 %v4072_v46, %v3961_v21  ;;  %v2174_v18 = vand.u32 2147483648, %v4197_v57  ;;  %v4219_v58 = vsub.f32 %v2205_v10, %v4089_v0 }
 0x2f9   : > { %v4222_v44 = vsub.f32 %v2206_v14, %v4099_v9  ;;  %v4225_v3 = vsub.f32 %v2207_v19, %v4089_v0  ;;  %v4228_v52 = vsub.f32 %v2208_v26, %v4099_v9  ;;  %v1557_v46 = vsel %vm1523_vm1, %v3906_v48, %v1556_v47  ;;  %v4273_v26 = vld [vmem:[%s3649_s17] ss:$2 sm:$0x3]  ;;  %s4427_s17 = scalar_lea.vmem [#allocation8], %s4113_s5 }
 0x2fa   : > { %v1613_v21 = vmul.f32 %v3886_v53, %v1606_v4  ;;  %v1614_v8 = vmul.f32 %v3896_v33, %v1610_v35  ;;  %vm2158_vm2 = vcmp.eq.f32.partialorder %v4195_v2, inf  ;;  %v1590_v25 = vadd.f32 %v1588_v59, %v3710_v6 }
 0x2fb   : > { %v1595_v49 = vsub.f32 %v1557_v46, %v3906_v48  ;;  %v1652_v51 = vcombine.high %v3964_v15, %v3972_v36  ;;  %v1694_v13 = vcombine.high %v3975_v37, %v3978_v34  ;;  %vm2160_vm3 = vcmp.eq.f32.partialorder %v4195_v2, 0.0 }
 0x2fc   : > { %vm2171_vm4 = vcmp.eq.f32.partialorder %v4197_v57, inf  ;;  %v1617_v53 = vcombine.high %v1613_v21, %v1614_v8  ;;  %v1743_v33 = vrot.slane %v4033_v38, %v3666_v63  ;;  %v1839_v4 = vmul.f32 0.125, %v1557_v46 }
 0x2fd   : > { %v4252_v54 = vsub.f32 %v4013_v16, %v4248_v56  ;;  %vm2173_vm5 = vcmp.eq.f32.partialorder %v4197_v57, 0.0  ;;  %v1596_v15 = vmul.f32 %v1595_v49, %v1594_v23  ;;  %vm1600_vm7 = vcmp.gt.f32.partialorder %v3906_v48, %v3771_v12 }
 0x2fe   : > { %v1659_v36 = vrot.slane %v1652_v51, %v3666_v63  ;;  %v1701_v37 = vrot.slane %v1694_v13, %v3666_v63  ;;  %v1845_v34 = vmul.f32 0.125, %v3906_v48  ;;  %v3301_v38 = vpop.eup %3300  ;;  %v1624_v30 = vrot.slane %v1617_v53, %v3666_v63 }
 0x2ff   : > { %vm1677_vm11 = vcmp.lt.f32.partialorder %v3916_v62, %v3768_v11  ;;  %v1744_v16 = vcombine.high %v1743_v33, %v1743_v33  ;;  %v1840_v50 = vadd.f32 1.0, %v1839_v4  ;;  %v1853_v60 = vmul.f32 0.125, %v3933_v61  ;;  %v4804_v4 = vld [vmem:[#allocation20_spill] sm:$0xff] }
 0x300   : > { %v1181_v32 = vmul.f32 %v3301_v38, %v4101_v45  ;;  %v1183_v17 = vmul.f32 %v3301_v38, %v4121_v55  ;;  %v1597_v7 = vadd.f32 %v1596_v15, %v3710_v6  ;;  %v1660_v1 = vcombine.high %v1659_v36, %v1659_v36  ;;  %v3303_v35 = vpop.eup %3302 }
 0x301   : > { %v1625_v10 = vcombine.high %v1624_v30, %v1624_v30  ;;  %v1708_v14 = vrot.slane %v1701_v37, %v3666_v63  ;;  %v4270_v19 = vsub.f32 %v3722_v39, %v1744_v16  ;;  %v4276_v47 = vsub.f32 %v1840_v50, %v4273_v26  ;;  %v3305_v23 = vpop.eup %3304  ;;  %v4805_v30 = vld [vmem:[#allocation35_spill] sm:$0xff] }
 0x302   : > { %v1189_v61 = vrot.slane %v1181_v32, 2  ;;  %v1190_v45 = vrot.slane %v1183_v17, 2  ;;  %v1598_v55 = vsel %vm1523_vm1, %v1590_v25, %v1597_v7  ;;  %v1667_v59 = vrot.slane %v1660_v1, %v3666_v63 }
 0x303   : > { %v2157_v46 = vmul.f32 %v3303_v35, %v4195_v2  ;;  %v1632_v21 = vrot.slane %v1625_v10, %v3666_v63  ;;  %v1709_v8 = vcombine.high %v1708_v14, %v1708_v14  ;;  %v1836_v49 = vmul.f32 0.125, %v1598_v55 }
 0x304   : > { %v2170_v51 = vmul.f32 %v3305_v23, %v4197_v57  ;;  %v1191_v13 = vsel %vm1087_vm12, %v1189_v61, %v1190_v45  ;;  %v4292_v53 = vadd.f32 %v1667_v59, %v3710_v6  ;;  %v4295_v33 = vsub.f32 %v1845_v34, %v4273_v26 }
 0x305   : > { %v2159_v25 = vsel %vm2158_vm2, %v4195_v2, %v2157_v46  ;;  %1197 = vst [vmem:[%s4281_s1] sm:$0xff] %v1191_v13  ;;  %v1634_v15 = vsub.f32 %v4804_v4, %v1632_v21  ;;  %v1711_v63 = vadd.f32 %v1709_v8, %v3716_v28  ;;  %v1837_v36 = vadd.f32 1.0, %v1836_v49 }
 0x306   : > { %v2162_v37 = vsel %vm2160_vm3, %v2161_v22, %v2159_v25  ;;  %v2172_v34 = vsel %vm2171_vm4, %v4197_v57, %v2170_v51  ;;  %v4311_v38 = vsub.f32 %v1853_v60, %v4248_v56  ;;  %v4314_v16 = vadd.f32 1.0, %v4805_v30 }
 0x307   : > { %v2175_v28 = vsel %vm2173_vm5, %v2174_v18, %v2172_v34  ;;  %v2260_v50 = vrot.slane %v2162_v37, %v3590_v42  ;;  %v2264_v2 = vrot.slane %v2162_v37, %v3593_v43  ;;  %v4326_v22 = vsel %vm1600_vm7, %v3906_v48, %v1634_v15 }
 0x308   : > { %v2176_v60 = vmul.f32 %v2175_v28, %v4149_v41  ;;  %v1673_v32 = vsub.f32 %v4326_v22, %v3906_v48  ;;  %v4335_v57 = vsel %vm1677_vm11, %v3916_v62, %v1711_v63  ;;  %v4338_v18 = vsub.f32 %v1837_v36, %v4248_v56 }
 0x309   : > { %v2365_v17 = vmul.f32 %v4179_v20, %v2260_v50  ;;  %v4342_v7 = vmul.f32 %v4204_v24, %v2264_v2  ;;  %v2267_v1 = vmul.f32 %v2260_v50, %v4219_v58  ;;  %v2367_v41 = vmul.f32 %v4207_v31, %v2260_v50 }
 0x30a   : > { %v2290_v10 = vrot.slane %v2176_v60, %v3590_v42  ;;  %v4348_v14 = vrot.slane %v2176_v60, %v3593_v43  ;;  %v2268_v35 = vmul.f32 %v2264_v2, %v4222_v44  ;;  %v4352_v61 = vmul.f32 %v4213_v27, %v2264_v2 }
 0x30b   : > { %v2373_v45 = vrot.slane %v2365_v17, 7  ;;  %v2374_v55 = vrot.slane %v4342_v7, 7  ;;  %v2375_v59 = vrot.slane %v2367_v41, 7  ;;  %v2269_v23 = vmul.f32 %v2260_v50, %v4225_v3  ;;  %v4806_v41 = vld [vmem:[#allocation23_spill] sm:$0xff] }
 0x30c   : > { %v2297_v46 = vmul.f32 %v2290_v10, %v4179_v20  ;;  %v2298_v21 = vmul.f32 %v4348_v14, %v4204_v24  ;;  %v2299_v8 = vmul.f32 %v2290_v10, %v4207_v31  ;;  %v2361_v49 = vmul.f32 %v2290_v10, %v4219_v58 }
 0x30d   : > { %v2300_v51 = vmul.f32 %v4348_v14, %v4213_v27  ;;  %v2362_v13 = vmul.f32 %v4348_v14, %v4222_v44  ;;  %v2377_v25 = vrot.slane %v4352_v61, 7  ;;  %v2363_v4 = vmul.f32 %v2290_v10, %v4225_v3 }
 0x30e   : > { %v2305_v15 = vrot.slane %v2297_v46, 7  ;;  %v2306_v63 = vrot.slane %v2298_v21, 7  ;;  %v2307_v20 = vrot.slane %v2299_v8, 7  ;;  %v2383_v36 = vadd.f32 %v2373_v45, %v2361_v49  ;;  %v4809_v46 = vld [vmem:[#allocation24_spill] sm:$0xff]  ;;  %v4810_v21 = vld [vmem:[#allocation27_spill] sm:$0xff] }
 0x30f   : > { %v2309_v37 = vrot.slane %v2300_v51, 7  ;;  %v2384_v24 = vadd.f32 %v2374_v55, %v2362_v13  ;;  %v2376_v31 = vsel %vm640_vm0, %v2373_v45, %v2375_v59  ;;  %v4371_v58 = vmul.f32 %v2264_v2, %v4228_v52  ;;  %v4807_v45 = vld [vmem:[#allocation29_spill] sm:$0xff] }
 0x310   : > { %v2315_v27 = vsub.f32 %v2267_v1, %v2305_v15  ;;  %v2387_v44 = vadd.f32 %v2383_v36, %v4043_v5  ;;  %v2316_v34 = vsub.f32 %v2268_v35, %v2306_v63  ;;  %v2308_v30 = vsel %vm640_vm0, %v2305_v15, %v2307_v20  ;;  %v4813_v15 = vld [vmem:[#allocation28_spill] sm:$0xff] }
 0x311   : > { %v2388_v3 = vadd.f32 %v2384_v24, %v4058_v29  ;;  %v2317_v28 = vsub.f32 %v2269_v23, %v2308_v30  ;;  %v2385_v50 = vadd.f32 %v2376_v31, %v2363_v4  ;;  %v2310_v60 = vsel %vm640_vm0, %v2306_v63, %v2309_v37  ;;  %v4808_v23 = vld [vmem:[#allocation21_spill] sm:$0xff]  ;;  %v4811_v4 = vld [vmem:[#allocation30_spill] sm:$0xff] }
 0x312   : > { %v2319_v17 = vadd.f32 %v2315_v27, %v4089_v0  ;;  %vm2402_vm13 = vcmp.ge.f32.partialorder %v2387_v44, %v4806_v41  ;;  %v2320_v10 = vadd.f32 %v2316_v34, %v4099_v9  ;;  %v2318_v2 = vsub.f32 %v4371_v58, %v2310_v60  ;;  %v4814_v31 = vld [vmem:[#allocation25_spill] sm:$0xff]  ;;  %v4815_v34 = vld [vmem:[#allocation31_spill] sm:$0xff] }
 0x313   : > { %v2406_v1 = vsel %vm2402_vm13, %v2387_v44, %v4806_v41  ;;  %vm2403_vm15 = vcmp.ge.f32.partialorder %v2388_v3, %v4807_v45  ;;  %v2321_v35 = vadd.f32 %v2317_v28, %v4089_v0  ;;  %v2389_v59 = vadd.f32 %v2385_v50, %v4043_v5  ;;  %v4812_v0 = vld [vmem:[#allocation22_spill] sm:$0xff]  ;;  %v4816_v50 = vld [vmem:[#allocation16_spill] sm:$0xff] }
 0x314   : > { %vm2334_vm1 = vcmp.ge.f32.partialorder %v2319_v17, %v4808_v23  ;;  %vm2421_vm2 = vcmp.le.f32.partialorder %v2406_v1, %v4809_v46  ;;  %vm2335_vm3 = vcmp.ge.f32.partialorder %v2320_v10, %v4810_v21  ;;  %v2407_v8 = vsel %vm2403_vm15, %v2388_v3, %v4807_v45 }
 0x315   : > { %v2338_v49 = vsel %vm2334_vm1, %v2319_v17, %v4808_v23  ;;  %v2425_v51 = vsel %vm2421_vm2, %v2387_v44, %v4809_v46  ;;  %v2339_v13 = vsel %vm2335_vm3, %v2320_v10, %v4810_v21  ;;  %vm2422_vm4 = vcmp.le.f32.partialorder %v2407_v8, %v4811_v4 }
 0x316   : > { %vm2046_vm5 = vcmask 1046528   ;;  %vm2353_vm13 = vcmp.le.f32.partialorder %v2338_v49, %v4812_v0  ;;  %v2451_v5 = vmul.f32 0.125, %v2425_v51  ;;  %vm2354_vm9 = vcmp.le.f32.partialorder %v2339_v13, %v4813_v15  ;;  %v4818_v49 = vld [vmem:[#allocation32_spill] sm:$0xff] }
 0x317   : > { %v4396_v63 = vsel %vm2422_vm4, %v2388_v3, %v4811_v4  ;;  %v2357_v20 = vsel %vm2353_vm13, %v2319_v17, %v4812_v0  ;;  %v4400_v36 = vsel %vm2354_vm9, %v2320_v10, %v4813_v15  ;;  %vm2336_vm15 = vcmp.ge.f32.partialorder %v2321_v35, %v4808_v23  ;;  %v4817_v17 = vld [vmem:[#allocation26_spill] sm:$0xff] }
 0x318   : > { %v2452_v37 = vmul.f32 0.125, %v4396_v63  ;;  %v2433_v24 = vrot.slane %v2357_v20, 1  ;;  %v2466_v58 = vsub.f32 %v2451_v5, %v4814_v31  ;;  %v2489_v27 = vmul.f32 0.125, %v2357_v20 }
 0x319   : > { %v2490_v3 = vmul.f32 0.125, %v4400_v36  ;;  %v2340_v28 = vsel %vm2336_vm15, %v2321_v35, %v4808_v23  ;;  %vm2404_vm9 = vcmp.ge.f32.partialorder %v2389_v59, %v4806_v41  ;;  %v4819_v23 = vld [vmem:[#allocation17_spill] sm:$0xff]  ;;  %v1869_v11 = vmul.f32 0.125, %v3722_v39 }
 0x31a   : > { %v2467_v30 = vsub.f32 %v2452_v37, %v4815_v34  ;;  %v2485_v60 = vadd.f32 %v4816_v50, %v2466_v58  ;;  %v2504_v10 = vsub.f32 %v2489_v27, %v4817_v17  ;;  %vm2355_vm1 = vcmp.le.f32.partialorder %v2340_v28, %v4812_v0 }
 0x31b   : > { %v2408_v1 = vsel %vm2404_vm9, %v2389_v59, %v4806_v41  ;;  %v2505_v13 = vsub.f32 %v2490_v3, %v4818_v49  ;;  %v2359_v5 = vsel %vm2355_vm1, %v2321_v35, %v4812_v0 }
 0x31c   : > { %v4415_v8 = vadd.f32 %v4816_v50, %v2467_v30  ;;  %vm2423_vm2 = vcmp.le.f32.partialorder %v2408_v1, %v4809_v46  ;;  %v2523_v20 = vadd.f32 %v4819_v23, %v2504_v10  ;;  %v2531_v37 = vrot.slane %v2485_v60, 1  ;;  %v4820_v60 = vld [vmem:[#allocation37_spill] sm:$0xff] }
 0x31d   : > { %v2427_v58 = vsel %vm2423_vm2, %v2389_v59, %v4809_v46  ;;  %v2434_v44 = vrot.slane %v2359_v5, 1  ;;  %v4423_v27 = vadd.f32 %v4819_v23, %v2505_v13  ;;  %v2491_v0 = vmul.f32 0.125, %v2359_v5 }
 0x31e   : > { %v2534_v41 = vrot.slane %v4415_v8, 1  ;;  %2449 = vst [vmem:[%s4427_s17 + $0x20] sm:$0x3] %v2427_v58  ;;  %v2453_v35 = vmul.f32 0.125, %v2427_v58  ;;  %v2322_v59 = vadd.f32 %v2318_v2, %v4099_v9  ;;  %v2364_v46 = vmul.f32 %v4348_v14, %v4228_v52 }
 0x31f   : > { %v2435_v30 = vsel %vm2046_vm5, %v2433_v24, %v2434_v44  ;;  %v2443_v3 = vsel %vm640_vm0, %v2434_v44, %v2425_v51  ;;  %v2506_v50 = vsub.f32 %v2491_v0, %v4817_v17  ;;  %v2378_v24 = vsel %vm640_vm0, %v2374_v55, %v2377_v25  ;;  %v4821_v51 = vld [vmem:[#allocation18_spill] sm:$0xff]  ;;  %v4825_v0 = vld [vmem:[#allocation36_spill] sm:$0xff] }
 0x320   : > { %2445 = vst [vmem:[%s4427_s17] sm:$0xff] %v2435_v30  ;;  %2447 = vst [vmem:[%s4427_s17 + $0x10] sm:$0xff] %v2443_v3  ;;  %v2468_v28 = vsub.f32 %v2453_v35, %v4814_v31  ;;  %v1674_v9 = vmul.f32 %v1673_v32, %v4820_v60  ;;  %vm2337_vm3 = vcmp.ge.f32.partialorder %v2322_v59, %v4810_v21  ;;  %v1850_v2 = vmul.f32 0.125, %v4326_v22  ;;  %v4822_v31 = vld [vmem:[#allocation19_spill] sm:$0xff]  ;;  %v4824_v35 = vld [vmem:[#allocation34_spill] sm:$0xff] }
 0x321   : > { %v2386_v52 = vadd.f32 %v2378_v24, %v2364_v46  ;;  %v1752_v14 = vsub.f32 %v4335_v57, %v3916_v62  ;;  %v2525_v7 = vadd.f32 %v4822_v31, %v2506_v50  ;;  %v2341_v44 = vsel %vm2337_vm3, %v2322_v59, %v4810_v21 }
 0x322   : > { %v2487_v61 = vadd.f32 %v4821_v51, %v2468_v28  ;;  %v1675_v55 = vadd.f32 %v1674_v9, %v3710_v6  ;;  %vm2356_vm4 = vcmp.le.f32.partialorder %v2341_v44, %v4813_v15  ;;  %v3106_v17 = vadd.f32 -1.0, %v1850_v2 }
 0x323   : > { %v2390_v32 = vadd.f32 %v2386_v52, %v4058_v29  ;;  %v1753_v25 = vmul.f32 %v1752_v14, %v4153_v40  ;;  %2547 = vst [vmem:[%s4460_s16 + $0x20] sm:$0x3] %v2525_v7  ;;  %v2360_v22 = vsel %vm2356_vm4, %v2322_v59, %v4813_v15  ;;  %v4470_v29 = vsub.f32 %v4314_v16, %v4273_v26 }
 0x324   : > { %v2532_v10 = vrot.slane %v2487_v61, 1  ;;  %v1676_v6 = vsel %vm1600_vm7, %v4292_v53, %v1675_v55  ;;  %v2437_v40 = vrot.slane %v2360_v22, 1  ;;  %v2492_v21 = vmul.f32 0.125, %v2360_v22 }
 0x325   : > { %vm2405_vm13 = vcmp.ge.f32.partialorder %v2390_v32, %v4807_v45  ;;  %v1754_v1 = vadd.f32 %v1753_v25, %v3722_v39  ;;  %v1847_v48 = vmul.f32 0.125, %v1676_v6  ;;  %v4823_v53 = vrot.slane %v4400_v36, 1 }
 0x326   : > { %v2533_v13 = vsel %vm2046_vm5, %v2531_v37, %v2532_v10  ;;  %v2541_v15 = vsel %vm640_vm0, %v2532_v10, %v2523_v20  ;;  %v2409_v12 = vsel %vm2405_vm13, %v2390_v32, %v4807_v45  ;;  %v2444_v5 = vsel %vm640_vm0, %v2437_v40, %v4396_v63 }
 0x327   : > { %2543 = vst [vmem:[%s4460_s16] sm:$0xff] %v2533_v13  ;;  %2545 = vst [vmem:[%s4460_s16 + $0x10] sm:$0xff] %v2541_v15  ;;  %vm2424_vm7 = vcmp.le.f32.partialorder %v2409_v12, %v4811_v4  ;;  %v2438_v16 = vsel %vm2046_vm5, %v4823_v53, %v2437_v40  ;;  %v2507_v23 = vsub.f32 %v2492_v21, %v4818_v49  ;;  %v1848_v20 = vadd.f32 1.0, %v1847_v48 }
 0x328   : > { %v2428_v37 = vsel %vm2424_vm7, %v2390_v32, %v4811_v4  ;;  %2446 = vst [vmem:[%s4427_s17 + $0x8] sm:$0xff] %v2438_v16  ;;  %2448 = vst [vmem:[%s4427_s17 + $0x18] sm:$0xff] %v2444_v5  ;;  %v1755_v45 = vsel %vm1677_vm11, %v4270_v19, %v1754_v1  ;;  %v4494_v36 = vsub.f32 %v3106_v17, %v4273_v26  ;;  %v1858_v49 = vmul.f32 0.125, %v4824_v35 }
 0x329   : > { %2450 = vst [vmem:[%s4427_s17 + $0x28] sm:$0x3] %v2428_v37  ;;  %v2454_v58 = vmul.f32 0.125, %v2428_v37  ;;  %v2526_v63 = vadd.f32 %v4822_v31, %v2507_v23  ;;  %v3107_v4 = vadd.f32 -1.0, %v4825_v0  ;;  %v4501_v30 = vsub.f32 %v1848_v20, %v4248_v56 }
 0x32a   : > { %v1863_v3 = vmul.f32 0.125, %v1755_v45  ;;  %v1866_v59 = vmul.f32 0.125, %v4335_v57  ;;  %v1859_v46 = vsub.f32 %v1858_v49, %v4248_v56  ;;  %v1872_v50 = vmul.f32 0.125, %v3916_v62 }
 0x32b   : > { %v2469_v19 = vsub.f32 %v2454_v58, %v4815_v34  ;;  %2548 = vst [vmem:[%s4460_s16 + $0x28] sm:$0x3] %v2526_v63  ;;  %v1862_v28 = vsub.f32 %v3107_v4, %v4273_v26  ;;  %v3109_v9 = vadd.f32 -1.0, %v1869_v11  ;;  %v1884_v52 = vrot.slane %v4338_v18, %v3590_v42 }
 0x32c   : > { %v3108_v24 = vadd.f32 -1.0, %v1863_v3  ;;  %v1867_v60 = vadd.f32 1.0, %v1866_v59  ;;  %v1873_v57 = vsub.f32 %v1872_v50, %v4273_v26  ;;  %v1888_v39 = vrot.slane %v4338_v18, %v3593_v43 }
 0x32d   : > { %v2488_v14 = vadd.f32 %v4821_v51, %v2469_v19  ;;  %v1895_v34 = vrot.slane %v4276_v47, %v3590_v42  ;;  %v1871_v61 = vsub.f32 %v3109_v9, %v4248_v56  ;;  %v1899_v31 = vrot.slane %v4276_v47, %v3593_v43  ;;  %v4827_v9 = vld [vmem:[#allocation33_spill] sm:$0xff] }
 0x32e   : > { %v1865_v2 = vsub.f32 %v3108_v24, %v4248_v56  ;;  %v1868_v62 = vsub.f32 %v1867_v60, %v4273_v26  ;;  %v1906_v7 = vrot.slane %v4252_v54, %v3590_v42  ;;  %v1910_v18 = vrot.slane %v4252_v54, %v3593_v43  ;;  %v4826_v60 = vld [vmem:[#allocation15_spill] sm:$0xff] }
 0x32f   : > { %v2535_v51 = vrot.slane %v2488_v14, 1  ;;  %v1917_v44 = vrot.slane %v4295_v33, %v3590_v42  ;;  %v1921_v55 = vrot.slane %v4295_v33, %v3593_v43  ;;  %v1928_v26 = vrot.slane %v4501_v30, %v3590_v42  ;;  %v1120_v14 = vld [vmem:[#allocation2 + $0x68] sm:$0xfc] }
 0x330   : > { %v1932_v56 = vrot.slane %v4501_v30, %v3593_v43  ;;  %v1939_v47 = vrot.slane %v4494_v36, %v3590_v42  ;;  %v1943_v25 = vrot.slane %v4494_v36, %v3593_v43  ;;  %v1950_v33 = vrot.slane %v4311_v38, %v3590_v42 }
 0x331   : > { %v2536_v32 = vsel %vm2046_vm5, %v2534_v41, %v2535_v51  ;;  %v2542_v54 = vsel %vm640_vm0, %v2535_v51, %v4423_v27  ;;  %v1954_v17 = vrot.slane %v4311_v38, %v3593_v43  ;;  %v1961_v10 = vrot.slane %v4470_v29, %v3590_v42 }
 0x332   : > { %2544 = vst [vmem:[%s4460_s16 + $0x8] sm:$0xff] %v2536_v32  ;;  %2546 = vst [vmem:[%s4460_s16 + $0x18] sm:$0xff] %v2542_v54  ;;  %v1965_v8 = vrot.slane %v4470_v29, %v3593_v43  ;;  %v1972_v41 = vrot.slane %v1859_v46, %v3590_v42  ;;  %v1976_v27 = vrot.slane %v1859_v46, %v3593_v43 }
 0x333   : > { %v1983_v22 = vrot.slane %v1862_v28, %v3590_v42  ;;  %v1987_v6 = vrot.slane %v1862_v28, %v3593_v43  ;;  %v1994_v40 = vrot.slane %v1865_v2, %v3590_v42  ;;  %v1998_v21 = vrot.slane %v1865_v2, %v3593_v43 }
 0x334   : > { %v2005_v38 = vrot.slane %v1868_v62, %v3590_v42  ;;  %v2009_v1 = vrot.slane %v1868_v62, %v3593_v43  ;;  %v2016_v13 = vrot.slane %v1871_v61, %v3590_v42  ;;  %v2020_v29 = vrot.slane %v1871_v61, %v3593_v43 }
 0x335   : > { %v2027_v15 = vrot.slane %v1873_v57, %v3590_v42  ;;  %v2031_v12 = vrot.slane %v1873_v57, %v3593_v43  ;;  %v2034_v48 = vsel %vm640_vm0, %v1884_v52, %v1895_v34  ;;  %v2035_v53 = vsel %vm640_vm0, %v1888_v39, %v1899_v31 }
 0x336   : > { %v2036_v16 = vsel %vm1125_vm10, %v2034_v48, %v1906_v7  ;;  %v2049_v5 = vsel %vm1125_vm10, 0.0, %v1972_v41  ;;  %v2050_v23 = vsel %vm1125_vm10, 0.0, %v1976_v27  ;;  %v2037_v37 = vsel %vm1125_vm10, %v2035_v53, %v1910_v18  ;;  %v2607_v48 = vld [vmem:[%s3641_s20 + $0x18] sm:$0xff] (%p3507_p6) }
 0x337   : > { %v2038_v45 = vsel %vm1342_vm14, %v2036_v16, %v1917_v44  ;;  %v2051_v20 = vsel %vm1342_vm14, %v2049_v5, %v1983_v22  ;;  %v2052_v42 = vsel %vm1342_vm14, %v2050_v23, %v1987_v6  ;;  %v2039_v43 = vsel %vm1342_vm14, %v2037_v37, %v1921_v55  ;;  %2608 = vst [vmem:[%s2588_s3 + $0x28] sm:$0xff] (%p3507_p6), %v2607_v48 }
 0x338   : > { %v2040_v36 = vsel %vm934_vm6, %v2038_v45, %v1928_v26  ;;  %v2053_v58 = vsel %vm934_vm6, %v2051_v20, %v1994_v40  ;;  %v2054_v63 = vsel %vm934_vm6, %v2052_v42, %v1998_v21  ;;  %v2041_v35 = vsel %vm934_vm6, %v2039_v43, %v1932_v56 }
 0x339   : > { %v2042_v49 = vsel %vm1104_vm8, %v2040_v36, %v1939_v47  ;;  %v2055_v0 = vsel %vm1104_vm8, %v2053_v58, %v2005_v38  ;;  %v2056_v4 = vsel %vm1104_vm8, %v2054_v63, %v2009_v1  ;;  %v2043_v30 = vsel %vm1104_vm8, %v2041_v35, %v1943_v25 }
 0x33a   : > { %v2044_v3 = vsel %vm1087_vm12, %v2042_v49, %v1950_v33  ;;  %v2057_v59 = vsel %vm1087_vm12, %v2055_v0, %v2016_v13  ;;  %v2058_v11 = vsel %vm1087_vm12, %v2056_v4, %v2020_v29  ;;  %v2045_v19 = vsel %vm1087_vm12, %v2043_v30, %v1954_v17  ;;  %v2601_v29 = vld [vmem:[%s3641_s20] sm:$0xff] (%p3507_p6) }
 0x33b   : > { %v2047_v46 = vsel %vm2046_vm5, %v2044_v3, %v1961_v10  ;;  %v2059_v28 = vsel %vm2046_vm5, %v2057_v59, %v2027_v15  ;;  %v2060_v50 = vsel %vm2046_vm5, %v2058_v11, %v2031_v12  ;;  %v2048_v24 = vsel %vm2046_vm5, %v2045_v19, %v1965_v8  ;;  %v2603_v15 = vld [vmem:[%s3641_s20 + $0x8] sm:$0xff] (%p3507_p6)  ;;  %v2605_v12 = vld [vmem:[%s3641_s20 + $0x10] sm:$0xff] (%p3507_p6)  ;;  %2602 = vst [vmem:[%s2588_s3] sm:$0xff] (%p3507_p6), %v2601_v29 }
 0x33c   : > { %2085 = vst [vmem:[%s4138_s23] sm:$0xff] %v2047_v46  ;;  %2087 = vst [vmem:[%s4138_s23 + $0x10] sm:$0xff] %v2059_v28  ;;  %v1012_v52 = vadd.f32 %v4827_v9, %v4826_v60  ;;  %vm4828_vm0 = vcmask 1047554  }
 0x33d   : > { %2088 = vst [vmem:[%s4138_s23 + $0x18] sm:$0xff] %v2060_v50  ;;  %2086 = vst [vmem:[%s4138_s23 + $0x8] sm:$0xff] %v2048_v24  ;;  %v1134_v39 = vsel %vm4828_vm0, %v1120_v14, -inf }
 0x33e   : > { %1029 = vst [vmem:[#allocation2 + $0x78] sm:$0xff] %v1012_v52  ;;  %2604 = vst [vmem:[%s2588_s3 + $0x8] sm:$0xff] (%p3507_p6), %v2603_v15 }
 0x33f   : > { %2606 = vst [vmem:[%s2588_s3 + $0x20] sm:$0xff] (%p3507_p6), %v2605_v12 }
 0x345   : > { %v1122_v57 = vld [vmem:[#allocation2 + $0x78] sm:$0x3] }
 0x346   : > { %v1135_v34 = vsel %vm1125_vm10, %v1122_v57, -inf }
 0x347   : > { %v1136_v2 = vmax.f32 %v1134_v39, %v1135_v34 }
 0x349   : > { %v1137_v62 = vrot.slane %v1136_v2, 4 }
 0x34b   : > { %v1138_v61 = vmax.f32 %v1136_v2, %v1137_v62 }
 0x34d   : > { %v1139_v31 = vrot.slane %v1138_v61, 2 }
 0x34f   : > { %v1140_v51 = vmax.f32 %v1138_v61, %v1139_v31 }
 0x351   : > { %v1141_v7 = vrot.slane %v1140_v51, 1 }
 0x353   : > { %v1142_v18 = vmax.f32 %v1140_v51, %v1141_v7 }
 0x355   : > { %v1144_v44 = vsub.f32 %v1120_v14, %v1142_v18  ;;  %v1146_v55 = vsub.f32 %v1122_v57, %v1142_v18 }
 0x357   : > { %v1149_v26 = vmul.f32 1.442695, %v1144_v44  ;;  %v1153_v56 = vmul.f32 1.442695, %v1146_v55 }
 0x359   : > { %3306 = vpow2.f32 %v1149_v26 }
 0x35a   : > { %3308 = vpow2.f32 %v1153_v56 }
 0x363   : > { %v3307_v47 = vpop.eup %3306 }
 0x364   : > { %v3309_v32 = vpop.eup %3308  ;;  %v1162_v54 = vrot.slane %v3307_v47, 2 }
 0x365   : > { %v1163_v25 = vrot.slane %v3309_v32, 2 }
 0x367   : > { %v1164_v33 = vsel %vm1087_vm12, %v1162_v54, %v1163_v25 }
 0x368   : > { %v1173_v17 = vrot.slane %v1164_v33, 4 }
 0x36a   : > { %v1174_v10 = vadd.f32 %v1173_v17, %v1164_v33 }
 0x36c   : > { %v1175_v8 = vrot.slane %v1174_v10, 2 }
 0x36e   : > { %v1176_v41 = vadd.f32 %v1175_v8, %v1174_v10 }
 0x370   : > { %v1177_v27 = vrot.slane %v1176_v41, 1 }
 0x372   : > { %v1178_v22 = vadd.f32 %v1177_v27, %v1176_v41 }
 0x374   : > { %3310 = vrcp.f32 %v1178_v22 }
 0x37e   : > { %v3311_v6 = vpop.eup %3310  ;;  %2585 = sbr.rel (!%p3507_p6) target bundleno = 901 (0x385), region = 94 }
 0x37f   : > { %v1182_v40 = vmul.f32 %v3311_v6, %v3307_v47  ;;  %v1184_v21 = vmul.f32 %v3311_v6, %v3309_v32 }
 0x381   : > { %v1192_v38 = vrot.slane %v1182_v40, 2  ;;  %v1193_v1 = vrot.slane %v1184_v21, 2 }
 0x383   : > { %v1194_v13 = vsel %vm1087_vm12, %v1192_v38, %v1193_v1 }
 0x384   : > { %1198 = vst [vmem:[%s4281_s1 + $0x8] sm:$0xff] %v1194_v13 }
 0x385 PF: > { %2614 = sbr.rel (!%p3507_p6) target bundleno = 908 (0x38c), region = 117  ;;  %s3134_s1 = sshll.u32 (%p3507_p6), %s3489_s22, 4  ;;  %v2630_v53 = vld [vmem:[%s3787_s25] sm:$0xff] (%p3507_p6)  ;;  %v2632_v16 = vld [vmem:[%s3787_s25 + $0x8] sm:$0xff] (%p3507_p6)  ;;  %v2634_v5 = vld [vmem:[%s3787_s25 + $0x10] sm:$0xff] (%p3507_p6) }
 0x386   : > { %s2617_s20 = scalar_lea.vmem (%p3507_p6), %s4727_s9, %s3134_s1  ;;  %v2636_v23 = vld [vmem:[%s3787_s25 + $0x18] sm:$0xff] (%p3507_p6) }
 0x387   : > { %2631 = vst [vmem:[%s2617_s20] sm:$0xff] (%p3507_p6), %v2630_v53  ;;  %2633 = vst [vmem:[%s2617_s20 + $0x8] sm:$0xff] (%p3507_p6), %v2632_v16 }
 0x388   : > { %2635 = vst [vmem:[%s2617_s20 + $0x20] sm:$0xff] (%p3507_p6), %v2634_v5  ;;  %2637 = vst [vmem:[%s2617_s20 + $0x28] sm:$0xff] (%p3507_p6), %v2636_v23 }
 0x38c PF: > { %2643 = sbr.rel (!%p3507_p6) target bundleno = 915 (0x393), region = 140  ;;  %s3135_s3 = sshll.u32 (%p3507_p6), %s3489_s22, 4  ;;  %v2659_v37 = vld [vmem:[%s4138_s23] sm:$0xff] (%p3507_p6)  ;;  %v2661_v45 = vld [vmem:[%s4138_s23 + $0x8] sm:$0xff] (%p3507_p6)  ;;  %v2663_v20 = vld [vmem:[%s4138_s23 + $0x10] sm:$0xff] (%p3507_p6) }
 0x38d   : > { %s2646_s1 = scalar_lea.vmem (%p3507_p6), %s4728_s10, %s3135_s3  ;;  %v2665_v42 = vld [vmem:[%s4138_s23 + $0x18] sm:$0xff] (%p3507_p6)  ;;  %v2667_v43 = vld [vmem:[%s4138_s23 + $0x20] sm:$0xff] (%p3507_p6)  ;;  %v2669_v36 = vld [vmem:[%s4138_s23 + $0x28] sm:$0xff] (%p3507_p6) }
 0x38e   : > { %2660 = vst [vmem:[%s2646_s1] sm:$0xff] (%p3507_p6), %v2659_v37  ;;  %2662 = vst [vmem:[%s2646_s1 + $0x8] sm:$0xff] (%p3507_p6), %v2661_v45 }
 0x38f   : > { %2664 = vst [vmem:[%s2646_s1 + $0x20] sm:$0xff] (%p3507_p6), %v2663_v20  ;;  %2666 = vst [vmem:[%s2646_s1 + $0x28] sm:$0xff] (%p3507_p6), %v2665_v42 }
 0x390   : > { %2668 = vst [vmem:[%s2646_s1 + $0x40] sm:$0xff] (%p3507_p6), %v2667_v43  ;;  %2670 = vst [vmem:[%s2646_s1 + $0x48] sm:$0xff] (%p3507_p6), %v2669_v36 }
 0x393 PF: > { %2676 = sbr.rel (!%p3507_p6) target bundleno = 922 (0x39a), region = 163  ;;  %s3136_s2 = sshll.u32 (%p3507_p6), %s3489_s22, 4  ;;  %v2692_v58 = vld [vmem:[%s4460_s16] sm:$0xff] (%p3507_p6)  ;;  %v2694_v63 = vld [vmem:[%s4460_s16 + $0x8] sm:$0xff] (%p3507_p6)  ;;  %v2696_v35 = vld [vmem:[%s4460_s16 + $0x10] sm:$0xff] (%p3507_p6) }
 0x394   : > { %s2679_s20 = scalar_lea.vmem (%p3507_p6), %s4729_s11, %s3136_s2  ;;  %v2698_v49 = vld [vmem:[%s4460_s16 + $0x18] sm:$0xff] (%p3507_p6)  ;;  %v2700_v0 = vld [vmem:[%s4460_s16 + $0x20] sm:$0xff] (%p3507_p6)  ;;  %v2702_v4 = vld [vmem:[%s4460_s16 + $0x28] sm:$0xff] (%p3507_p6) }
 0x395   : > { %2693 = vst [vmem:[%s2679_s20] sm:$0xff] (%p3507_p6), %v2692_v58  ;;  %2695 = vst [vmem:[%s2679_s20 + $0x8] sm:$0xff] (%p3507_p6), %v2694_v63 }
 0x396   : > { %2697 = vst [vmem:[%s2679_s20 + $0x20] sm:$0xff] (%p3507_p6), %v2696_v35  ;;  %2699 = vst [vmem:[%s2679_s20 + $0x28] sm:$0xff] (%p3507_p6), %v2698_v49 }
 0x397   : > { %2701 = vst [vmem:[%s2679_s20 + $0x40] sm:$0xff] (%p3507_p6), %v2700_v0  ;;  %2703 = vst [vmem:[%s2679_s20 + $0x48] sm:$0xff] (%p3507_p6), %v2702_v4 }
 0x39a PF: > { %s3137_s3 = sshll.u32 %s3489_s22, 8  ;;  %s2716_s25 = sshll.u32 %s4427_s17, 4  ;;  %s4655_s25 = int_to_ptr.vmem [resolvable:$true] %s2716_s25 }
 0x39b   : > { %s4653_s23 = scalar_lea.hbm %s4730_s12, %s3137_s3  ;;  %s3314_s16 = scalar_lea.vmem %s4655_s25, 768 }
 0x39c   : > { %p3315_p0 = scmp.ne.s32.totalorder %s4655_s25, %s3314_s16  ;;  %s3384_s2 = smov [#allocation8]  }
 0x39d   : > { %s3318_s4 = sshll.u32 %s3384_s2, 4  ;;  %s3319_s4 = int_to_ptr.vmem [resolvable:$false] %s3318_s4 }
 0x39e   : > { %p3316_p1 = pnand %p3315_p0, %p3507_p6  ;;  %s3320_s20 = scalar_lea.vmem %s3319_s4, 1536 }
 0x39f   : > { %p3321_p3 = scmp.lt.s32.totalorder %s4655_s25, %s3319_s4  ;;  %p3322_p4 = scmp.lt.s32.totalorder %s3320_s20, %s3314_s16 }
 0x3a0   : > { %p3317_p2 = pneg %p3316_p1 }
 0x3a1   : > { %p3323_p5 = por %p3322_p4, %p3321_p3 }
 0x3a3   : > { %p3324_p7 = pnand %p3323_p5, %p3317_p2 }
 0x3a5   : > { %3327 = shalt.err (!%p3324_p7)
}
 0x3a6   : > { %s3328_s17 = scalar_lea.hbm %s4653_s23, 768  ;;  %s3332_s1 = scalar_lea.hbm %s4730_s12, 1536 }
 0x3a7   : > { %p3329_p10 = scmp.ne.s32.totalorder %s4653_s23, %s3328_s17  ;;  %p3333_p13 = scmp.lt.u32.totalorder %s4653_s23, %s4730_s12 }
 0x3a8   : > { %p3334_p0 = scmp.lt.u32.totalorder %s3332_s1, %s3328_s17  ;;  %p3336_p2 = scmp.lt.u32.totalorder %s3328_s17, %s4653_s23 }
 0x3a9   : > { %p3330_p11 = pnand %p3329_p10, %p3507_p6 }
 0x3aa   : > { %p3335_p1 = por %p3334_p0, %p3333_p13 }
 0x3ab   : > { %p3331_p12 = pneg %p3330_p11 }
 0x3ac   : > { %p3337_p3 = por %p3336_p2, %p3335_p1 }
 0x3ae   : > { %p3338_p4 = pnand %p3337_p3, %p3331_p12 }
 0x3b0   : > { %3341 = shalt.err (!%p3338_p4)
}
 0x3b1   : > { %s3385_s16 = smov 256   ;;  %s3386_s20 = smov 512   ;;  %v2741_v30 = vld [vmem:[%s3866_s0] sm:$0xff] (%p3507_p6)  ;;  %v2743_v3 = vld [vmem:[%s3866_s0 + $0x8] sm:$0xff] (%p3507_p6)  ;;  %v2745_v59 = vld [vmem:[%s3866_s0 + $0x10] sm:$0xff] (%p3507_p6) }
 0x3b2   : > { %s3387_s5 = smov 16   ;;  %s4829_s3 = scalar_lea.sflag [#allocation9], %s3526_s30  ;;  %v2747_v11 = vld [vmem:[%s3866_s0 + $0x18] sm:$0xff] (%p3507_p6) }
 0x3b3   : > { %3143 = dma.vmem_to_hbm [thread:$0]  (%p3507_p6), %s4655_s25, 768, %s4653_s23, %s4829_s3, %s3385_s16, %s3386_s20, %s3387_s5  }
 0x3b4   : > { %2725 = sbr.rel (!%p3507_p6) target bundleno = 955 (0x3bb), region = 190  ;;  %s3138_s17 = sshll.u32 (%p3507_p6), %s3489_s22, 4 }
 0x3b5   : > { %s2728_s2 = scalar_lea.vmem (%p3507_p6), %s4731_s13, %s3138_s17 }
 0x3b6   : > { %2742 = vst [vmem:[%s2728_s2] sm:$0xff] (%p3507_p6), %v2741_v30  ;;  %2744 = vst [vmem:[%s2728_s2 + $0x8] sm:$0xff] (%p3507_p6), %v2743_v3 }
 0x3b7   : > { %2746 = vst [vmem:[%s2728_s2 + $0x20] sm:$0xff] (%p3507_p6), %v2745_v59  ;;  %2748 = vst [vmem:[%s2728_s2 + $0x28] sm:$0xff] (%p3507_p6), %v2747_v11 }
 0x3bb PF: > { %2754 = sbr.rel (!%p3507_p6) target bundleno = 962 (0x3c2), region = 213  ;;  %s3139_s30 = sshll.u32 (%p3507_p6), %s3489_s22, 4  ;;  %v2770_v19 = vld [vmem:[%s3876_s26] sm:$0xff] (%p3507_p6)  ;;  %v2772_v46 = vld [vmem:[%s3876_s26 + $0x8] sm:$0xff] (%p3507_p6)  ;;  %v2774_v28 = vld [vmem:[%s3876_s26 + $0x10] sm:$0xff] (%p3507_p6) }
 0x3bc   : > { %s2757_s0 = scalar_lea.vmem (%p3507_p6), %s4732_s14, %s3139_s30  ;;  %v2776_v50 = vld [vmem:[%s3876_s26 + $0x18] sm:$0xff] (%p3507_p6) }
 0x3bd   : > { %2771 = vst [vmem:[%s2757_s0] sm:$0xff] (%p3507_p6), %v2770_v19  ;;  %2773 = vst [vmem:[%s2757_s0 + $0x8] sm:$0xff] (%p3507_p6), %v2772_v46 }
 0x3be   : > { %2775 = vst [vmem:[%s2757_s0 + $0x20] sm:$0xff] (%p3507_p6), %v2774_v28  ;;  %2777 = vst [vmem:[%s2757_s0 + $0x28] sm:$0xff] (%p3507_p6), %v2776_v50 }
 0x3c2 PF: > { %s2821_s28 = sand.u32 1, %s3364_s18   ;;  %p3146_p6 = pnand %p3053_p9, %p3511_p8 }
 0x3c3   : > { %s2822_s22 = scalar_lea.sflag [#allocation9], %s2821_s28 }
 0x3c4   : > { %3359 = dma.done.wait (!%p3146_p6), %s2822_s22, 768  }
 0x3c5   : > { %3361 = vsyncadd (!%p3146_p6), %s2822_s22, 4294966528  ;;  %s4830_s23 = sld [smem:[#allocation13_spill]]  ;;  %s4831_s20 = sld [smem:[#allocation14_spill]] }
 0x3c6   : > { %p26_p5 = scmp.ge.s32.totalorder %s3493_s24, 4   ;;  %s4832_s18 = smov %s3368_s19 }
 0x3c7   : > { %s4834_s21 = smov %s3493_s24 }
 0x3c8   :  { %28 = sbr.rel (!%p26_p5) target bundleno = 10 (0xa), region = 359 }
 0x3cb   : > { %s4833_s19 = smov %s4830_s23 }
 0x3cf   :  { %2849 = vsyncpa [#allocation9], 1 }
 0x3d0   :  { %2851 = vsyncpa [#allocation9 + $0x1], 1 }

</bundles_post_ra>
